<compile_context>
chip_gen: v5e
topology: v5e:2x2
jax: 0.10.0
libtpu: 0.0.40
codegen_flags: <defaults>
</compile_context>

<pallas_src>
import functools

import jax
import jax.numpy as jnp
from jax.experimental import pallas as pl
from jax.experimental.pallas import tpu as pltpu


def _cdiv(a, b):
    return -(-a // b)


def nps_kernel(colors_ref, patch_ref, out_ref, *, slab_rows, n_slabs):
    """One tile of the NPS loss.

    colors_ref: SMEM (N, 4) f32 rows [cp0, cp1, cp2, b] with cp = -2*(c - 1e-6)
                and b = ||c - 1e-6||^2 + 1e-6 (sqrt bias folded in).
    patch_ref : VMEM (3, tile_rows, 128) lane-dense tile of the flattened
                patch, native dtype.
    out_ref   : VMEM (slab_rows, 128) f32 per-tile partial sums (lane-dense).
    """
    n_colors = colors_ref.shape[0]
    # Hoist all SMEM scalar reads above the slab loop (read once per tile).
    cp0 = [colors_ref[n, 0] for n in range(n_colors)]
    cp1 = [colors_ref[n, 1] for n in range(n_colors)]
    cp2 = [colors_ref[n, 2] for n in range(n_colors)]
    bias = [colors_ref[n, 3] for n in range(n_colors)]

    def slab_body(s, carry):
        r0 = pl.multiple_of(s * slab_rows, slab_rows)
        p0 = patch_ref[0, pl.ds(r0, slab_rows), :].astype(jnp.float32)
        p1 = patch_ref[1, pl.ds(r0, slab_rows), :].astype(jnp.float32)
        p2 = patch_ref[2, pl.ds(r0, slab_rows), :].astype(jnp.float32)
        p_sq = p0 * p0 + p1 * p1 + p2 * p2  # color-independent ||p||^2

        min_cross = None
        for n in range(n_colors):
            cross = p0 * cp0[n] + p1 * cp1[n] + p2 * cp2[n] + bias[n]
            min_cross = cross if min_cross is None else jnp.minimum(min_cross, cross)

        # ||p - c~||^2 + 1e-6 == p_sq + min_cross (sqrt is monotone, so the
        # min can be taken on squared distances).  The max() guards against
        # tiny negative values from f32 cancellation when p ~= c~.
        min_d = jnp.sqrt(jnp.maximum(p_sq + min_cross, 0.0))
        return carry + min_d

    out_ref[...] = jax.lax.fori_loop(
        0, n_slabs, slab_body, jnp.zeros((slab_rows, 128), jnp.float32))


def nps_loss(adv_patch, colors, *, max_tile_rows=512, slab_rows=32):
    """adv_patch: (3, H, W) in [0, 1]; colors: (N, 3) float32 printable triplets."""
    C, H, W = adv_patch.shape
    assert C == 3
    n_pixels = H * W
    numel = float(C * n_pixels)

    # ---- lane-dense layout: flatten (H, W), pad up to whole tiles ----------
    rows = _cdiv(n_pixels, 128)
    rows_s = _cdiv(rows, slab_rows) * slab_rows
    if rows_s <= slab_rows:
        tile_rows = slab_rows  # tiny patch: a single slab / single grid step
    else:
        # Prefer >= 2 tiles: 2-TC parallelism on v7x, DMA/compute overlap on v5e.
        half = _cdiv(_cdiv(rows_s, 2), slab_rows) * slab_rows
        tile_rows = max(slab_rows, min(max_tile_rows, half))
    num_tiles = _cdiv(rows, tile_rows)
    rows_pad = num_tiles * tile_rows
    pad = rows_pad * 128 - n_pixels

    # Keep the patch in its native dtype (kernel casts per slab); pads are 0.
    flat = adv_patch.reshape(C, n_pixels)
    flat = jnp.pad(flat, ((0, 0), (0, pad)))
    patch3d = flat.reshape(C, rows_pad, 128)

    # ---- color table:  ||p - c~||^2 + 1e-6 = ||p||^2 + (p . cp + b) --------
    c_shift = colors.astype(jnp.float32) - 1e-6                    # c~ = c - 1e-6
    cp = -2.0 * c_shift                                            # (N, 3)
    b = jnp.sum(c_shift * c_shift, axis=1, keepdims=True) + 1e-6   # (N, 1)
    color_tab = jnp.concatenate([cp, b], axis=1)                   # (N, 4) -> SMEM

    kernel = functools.partial(
        nps_kernel, slab_rows=slab_rows, n_slabs=tile_rows // slab_rows)

    partials = pl.pallas_call(
        kernel,
        out_shape=jax.ShapeDtypeStruct((num_tiles * slab_rows, 128), jnp.float32),
        grid=(num_tiles,),
        in_specs=[
            pl.BlockSpec(memory_space=pltpu.SMEM),                    # color table
            pl.BlockSpec((C, tile_rows, 128), lambda i: (0, i, 0)),   # patch tile
        ],
        out_specs=pl.BlockSpec((slab_rows, 128), lambda i: (i, 0)),   # per-tile partials
        compiler_params=pltpu.CompilerParams(
            dimension_semantics=("parallel",)),
    )(color_tab, patch3d)

    total = jnp.sum(partials)
    if pad:
        # Every zero-padded pixel contributes exactly sqrt(min_n b_n) in-kernel
        # (p_sq = 0, cross_n = b_n); subtract the closed-form correction.
        total = total - pad * jnp.sqrt(jnp.min(b))
    return total / numel


def nps_loss_ref(adv_patch, colors):
    """Pure-JAX reference mirroring the PyTorch forward exactly."""
    pa = colors[:, :, None, None]                       # (N, 3, 1, 1) constant planes
    color_dist = adv_patch[None] - pa + 1e-06           # (N, 3, H, W)
    color_dist = color_dist ** 2
    color_dist = jnp.sum(color_dist, axis=1) + 1e-06    # (N, H, W)
    color_dist = jnp.sqrt(color_dist)
    color_dist_prod = jnp.min(color_dist, axis=0)       # (H, W)
    nps_score = jnp.sum(color_dist_prod)
    return nps_score / adv_patch.size


if __name__ == "__main__":
    key = jax.random.PRNGKey(0)
    k_patch, k_colors, k_patch2 = jax.random.split(key, 3)

    N_TRIPLETS = 30  # synthetic stand-in for the CSV of printable RGB triplets
    colors = jax.random.uniform(k_colors, (N_TRIPLETS, 3), dtype=jnp.float32)

    # Tolerances: the -2 p.c expansion differs from the direct (p-c)^2 form by
    # f32-rounding-level amounts, so compare at rtol=1e-4.
    # Single-tile patch (exercises the zero-padding correction: 256 px -> 32x128).
    adv_patch = jax.random.uniform(k_patch, (3, 16, 16), dtype=jnp.float32)
    out = jax.block_until_ready(nps_loss(adv_patch, colors))
    ref = nps_loss_ref(adv_patch, colors)
    assert jnp.allclose(out, ref, rtol=1e-4, atol=1e-6), (out, ref)

    # Multi-tile patch (40 rows -> 2 parallel grid steps of 32 rows each).
    adv_patch2 = jax.random.uniform(k_patch2, (3, 64, 80), dtype=jnp.float32)
    out2 = jax.block_until_ready(nps_loss(adv_patch2, colors))
    ref2 = nps_loss_ref(adv_patch2, colors)
    assert jnp.allclose(out2, ref2, rtol=1e-4, atol=1e-6), (out2, ref2)

    print("KERNEL_OK")
</pallas_src>

<mosaic_0001>
module attributes {stable_mosaic.version = 11 : i64} {
  func.func @nps_kernel(%arg0: i32, %arg1: memref<30x4xf32, #tpu.memory_space<smem>>, %arg2: memref<3x32x128xf32, #tpu.memory_space<vmem>>, %arg3: memref<32x128xf32, #tpu.memory_space<vmem>>) attributes {dimension_semantics = [#tpu.dimension_semantics<parallel>], iteration_bounds = array<i64: 1>, scalar_prefetch = 0 : i64, scratch_operands = 0 : i64, tpu.core_type = #tpu.core_type<tc>, window_params = [{transform_indices = @transform_0, window_bounds = array<i64: 30, 4>}, {transform_indices = @transform_1, window_bounds = array<i64: 3, 32, 128>}, {transform_indices = @transform_2, window_bounds = array<i64: 32, 128>}]} {
    %c0 = arith.constant 0 : index
    %c0_0 = arith.constant 0 : index
    %0 = memref.load %arg1[%c0, %c0_0] : memref<30x4xf32, #tpu.memory_space<smem>>
    %c1 = arith.constant 1 : index
    %c0_1 = arith.constant 0 : index
    %1 = memref.load %arg1[%c1, %c0_1] : memref<30x4xf32, #tpu.memory_space<smem>>
    %c2 = arith.constant 2 : index
    %c0_2 = arith.constant 0 : index
    %2 = memref.load %arg1[%c2, %c0_2] : memref<30x4xf32, #tpu.memory_space<smem>>
    %c3 = arith.constant 3 : index
    %c0_3 = arith.constant 0 : index
    %3 = memref.load %arg1[%c3, %c0_3] : memref<30x4xf32, #tpu.memory_space<smem>>
    %c4 = arith.constant 4 : index
    %c0_4 = arith.constant 0 : index
    %4 = memref.load %arg1[%c4, %c0_4] : memref<30x4xf32, #tpu.memory_space<smem>>
    %c5 = arith.constant 5 : index
    %c0_5 = arith.constant 0 : index
    %5 = memref.load %arg1[%c5, %c0_5] : memref<30x4xf32, #tpu.memory_space<smem>>
    %c6 = arith.constant 6 : index
    %c0_6 = arith.constant 0 : index
    %6 = memref.load %arg1[%c6, %c0_6] : memref<30x4xf32, #tpu.memory_space<smem>>
    %c7 = arith.constant 7 : index
    %c0_7 = arith.constant 0 : index
    %7 = memref.load %arg1[%c7, %c0_7] : memref<30x4xf32, #tpu.memory_space<smem>>
    %c8 = arith.constant 8 : index
    %c0_8 = arith.constant 0 : index
    %8 = memref.load %arg1[%c8, %c0_8] : memref<30x4xf32, #tpu.memory_space<smem>>
    %c9 = arith.constant 9 : index
    %c0_9 = arith.constant 0 : index
    %9 = memref.load %arg1[%c9, %c0_9] : memref<30x4xf32, #tpu.memory_space<smem>>
    %c10 = arith.constant 10 : index
    %c0_10 = arith.constant 0 : index
    %10 = memref.load %arg1[%c10, %c0_10] : memref<30x4xf32, #tpu.memory_space<smem>>
    %c11 = arith.constant 11 : index
    %c0_11 = arith.constant 0 : index
    %11 = memref.load %arg1[%c11, %c0_11] : memref<30x4xf32, #tpu.memory_space<smem>>
    %c12 = arith.constant 12 : index
    %c0_12 = arith.constant 0 : index
    %12 = memref.load %arg1[%c12, %c0_12] : memref<30x4xf32, #tpu.memory_space<smem>>
    %c13 = arith.constant 13 : index
    %c0_13 = arith.constant 0 : index
    %13 = memref.load %arg1[%c13, %c0_13] : memref<30x4xf32, #tpu.memory_space<smem>>
    %c14 = arith.constant 14 : index
    %c0_14 = arith.constant 0 : index
    %14 = memref.load %arg1[%c14, %c0_14] : memref<30x4xf32, #tpu.memory_space<smem>>
    %c15 = arith.constant 15 : index
    %c0_15 = arith.constant 0 : index
    %15 = memref.load %arg1[%c15, %c0_15] : memref<30x4xf32, #tpu.memory_space<smem>>
    %c16 = arith.constant 16 : index
    %c0_16 = arith.constant 0 : index
    %16 = memref.load %arg1[%c16, %c0_16] : memref<30x4xf32, #tpu.memory_space<smem>>
    %c17 = arith.constant 17 : index
    %c0_17 = arith.constant 0 : index
    %17 = memref.load %arg1[%c17, %c0_17] : memref<30x4xf32, #tpu.memory_space<smem>>
    %c18 = arith.constant 18 : index
    %c0_18 = arith.constant 0 : index
    %18 = memref.load %arg1[%c18, %c0_18] : memref<30x4xf32, #tpu.memory_space<smem>>
    %c19 = arith.constant 19 : index
    %c0_19 = arith.constant 0 : index
    %19 = memref.load %arg1[%c19, %c0_19] : memref<30x4xf32, #tpu.memory_space<smem>>
    %c20 = arith.constant 20 : index
    %c0_20 = arith.constant 0 : index
    %20 = memref.load %arg1[%c20, %c0_20] : memref<30x4xf32, #tpu.memory_space<smem>>
    %c21 = arith.constant 21 : index
    %c0_21 = arith.constant 0 : index
    %21 = memref.load %arg1[%c21, %c0_21] : memref<30x4xf32, #tpu.memory_space<smem>>
    %c22 = arith.constant 22 : index
    %c0_22 = arith.constant 0 : index
    %22 = memref.load %arg1[%c22, %c0_22] : memref<30x4xf32, #tpu.memory_space<smem>>
    %c23 = arith.constant 23 : index
    %c0_23 = arith.constant 0 : index
    %23 = memref.load %arg1[%c23, %c0_23] : memref<30x4xf32, #tpu.memory_space<smem>>
    %c24 = arith.constant 24 : index
    %c0_24 = arith.constant 0 : index
    %24 = memref.load %arg1[%c24, %c0_24] : memref<30x4xf32, #tpu.memory_space<smem>>
    %c25 = arith.constant 25 : index
    %c0_25 = arith.constant 0 : index
    %25 = memref.load %arg1[%c25, %c0_25] : memref<30x4xf32, #tpu.memory_space<smem>>
    %c26 = arith.constant 26 : index
    %c0_26 = arith.constant 0 : index
    %26 = memref.load %arg1[%c26, %c0_26] : memref<30x4xf32, #tpu.memory_space<smem>>
    %c27 = arith.constant 27 : index
    %c0_27 = arith.constant 0 : index
    %27 = memref.load %arg1[%c27, %c0_27] : memref<30x4xf32, #tpu.memory_space<smem>>
    %c28 = arith.constant 28 : index
    %c0_28 = arith.constant 0 : index
    %28 = memref.load %arg1[%c28, %c0_28] : memref<30x4xf32, #tpu.memory_space<smem>>
    %c29 = arith.constant 29 : index
    %c0_29 = arith.constant 0 : index
    %29 = memref.load %arg1[%c29, %c0_29] : memref<30x4xf32, #tpu.memory_space<smem>>
    %c0_30 = arith.constant 0 : index
    %c1_31 = arith.constant 1 : index
    %30 = memref.load %arg1[%c0_30, %c1_31] : memref<30x4xf32, #tpu.memory_space<smem>>
    %c1_32 = arith.constant 1 : index
    %c1_33 = arith.constant 1 : index
    %31 = memref.load %arg1[%c1_32, %c1_33] : memref<30x4xf32, #tpu.memory_space<smem>>
    %c2_34 = arith.constant 2 : index
    %c1_35 = arith.constant 1 : index
    %32 = memref.load %arg1[%c2_34, %c1_35] : memref<30x4xf32, #tpu.memory_space<smem>>
    %c3_36 = arith.constant 3 : index
    %c1_37 = arith.constant 1 : index
    %33 = memref.load %arg1[%c3_36, %c1_37] : memref<30x4xf32, #tpu.memory_space<smem>>
    %c4_38 = arith.constant 4 : index
    %c1_39 = arith.constant 1 : index
    %34 = memref.load %arg1[%c4_38, %c1_39] : memref<30x4xf32, #tpu.memory_space<smem>>
    %c5_40 = arith.constant 5 : index
    %c1_41 = arith.constant 1 : index
    %35 = memref.load %arg1[%c5_40, %c1_41] : memref<30x4xf32, #tpu.memory_space<smem>>
    %c6_42 = arith.constant 6 : index
    %c1_43 = arith.constant 1 : index
    %36 = memref.load %arg1[%c6_42, %c1_43] : memref<30x4xf32, #tpu.memory_space<smem>>
    %c7_44 = arith.constant 7 : index
    %c1_45 = arith.constant 1 : index
    %37 = memref.load %arg1[%c7_44, %c1_45] : memref<30x4xf32, #tpu.memory_space<smem>>
    %c8_46 = arith.constant 8 : index
    %c1_47 = arith.constant 1 : index
    %38 = memref.load %arg1[%c8_46, %c1_47] : memref<30x4xf32, #tpu.memory_space<smem>>
    %c9_48 = arith.constant 9 : index
    %c1_49 = arith.constant 1 : index
    %39 = memref.load %arg1[%c9_48, %c1_49] : memref<30x4xf32, #tpu.memory_space<smem>>
    %c10_50 = arith.constant 10 : index
    %c1_51 = arith.constant 1 : index
    %40 = memref.load %arg1[%c10_50, %c1_51] : memref<30x4xf32, #tpu.memory_space<smem>>
    %c11_52 = arith.constant 11 : index
    %c1_53 = arith.constant 1 : index
    %41 = memref.load %arg1[%c11_52, %c1_53] : memref<30x4xf32, #tpu.memory_space<smem>>
    %c12_54 = arith.constant 12 : index
    %c1_55 = arith.constant 1 : index
    %42 = memref.load %arg1[%c12_54, %c1_55] : memref<30x4xf32, #tpu.memory_space<smem>>
    %c13_56 = arith.constant 13 : index
    %c1_57 = arith.constant 1 : index
    %43 = memref.load %arg1[%c13_56, %c1_57] : memref<30x4xf32, #tpu.memory_space<smem>>
    %c14_58 = arith.constant 14 : index
    %c1_59 = arith.constant 1 : index
    %44 = memref.load %arg1[%c14_58, %c1_59] : memref<30x4xf32, #tpu.memory_space<smem>>
    %c15_60 = arith.constant 15 : index
    %c1_61 = arith.constant 1 : index
    %45 = memref.load %arg1[%c15_60, %c1_61] : memref<30x4xf32, #tpu.memory_space<smem>>
    %c16_62 = arith.constant 16 : index
    %c1_63 = arith.constant 1 : index
    %46 = memref.load %arg1[%c16_62, %c1_63] : memref<30x4xf32, #tpu.memory_space<smem>>
    %c17_64 = arith.constant 17 : index
    %c1_65 = arith.constant 1 : index
    %47 = memref.load %arg1[%c17_64, %c1_65] : memref<30x4xf32, #tpu.memory_space<smem>>
    %c18_66 = arith.constant 18 : index
    %c1_67 = arith.constant 1 : index
    %48 = memref.load %arg1[%c18_66, %c1_67] : memref<30x4xf32, #tpu.memory_space<smem>>
    %c19_68 = arith.constant 19 : index
    %c1_69 = arith.constant 1 : index
    %49 = memref.load %arg1[%c19_68, %c1_69] : memref<30x4xf32, #tpu.memory_space<smem>>
    %c20_70 = arith.constant 20 : index
    %c1_71 = arith.constant 1 : index
    %50 = memref.load %arg1[%c20_70, %c1_71] : memref<30x4xf32, #tpu.memory_space<smem>>
    %c21_72 = arith.constant 21 : index
    %c1_73 = arith.constant 1 : index
    %51 = memref.load %arg1[%c21_72, %c1_73] : memref<30x4xf32, #tpu.memory_space<smem>>
    %c22_74 = arith.constant 22 : index
    %c1_75 = arith.constant 1 : index
    %52 = memref.load %arg1[%c22_74, %c1_75] : memref<30x4xf32, #tpu.memory_space<smem>>
    %c23_76 = arith.constant 23 : index
    %c1_77 = arith.constant 1 : index
    %53 = memref.load %arg1[%c23_76, %c1_77] : memref<30x4xf32, #tpu.memory_space<smem>>
    %c24_78 = arith.constant 24 : index
    %c1_79 = arith.constant 1 : index
    %54 = memref.load %arg1[%c24_78, %c1_79] : memref<30x4xf32, #tpu.memory_space<smem>>
    %c25_80 = arith.constant 25 : index
    %c1_81 = arith.constant 1 : index
    %55 = memref.load %arg1[%c25_80, %c1_81] : memref<30x4xf32, #tpu.memory_space<smem>>
    %c26_82 = arith.constant 26 : index
    %c1_83 = arith.constant 1 : index
    %56 = memref.load %arg1[%c26_82, %c1_83] : memref<30x4xf32, #tpu.memory_space<smem>>
    %c27_84 = arith.constant 27 : index
    %c1_85 = arith.constant 1 : index
    %57 = memref.load %arg1[%c27_84, %c1_85] : memref<30x4xf32, #tpu.memory_space<smem>>
    %c28_86 = arith.constant 28 : index
    %c1_87 = arith.constant 1 : index
    %58 = memref.load %arg1[%c28_86, %c1_87] : memref<30x4xf32, #tpu.memory_space<smem>>
    %c29_88 = arith.constant 29 : index
    %c1_89 = arith.constant 1 : index
    %59 = memref.load %arg1[%c29_88, %c1_89] : memref<30x4xf32, #tpu.memory_space<smem>>
    %c0_90 = arith.constant 0 : index
    %c2_91 = arith.constant 2 : index
    %60 = memref.load %arg1[%c0_90, %c2_91] : memref<30x4xf32, #tpu.memory_space<smem>>
    %c1_92 = arith.constant 1 : index
    %c2_93 = arith.constant 2 : index
    %61 = memref.load %arg1[%c1_92, %c2_93] : memref<30x4xf32, #tpu.memory_space<smem>>
    %c2_94 = arith.constant 2 : index
    %c2_95 = arith.constant 2 : index
    %62 = memref.load %arg1[%c2_94, %c2_95] : memref<30x4xf32, #tpu.memory_space<smem>>
    %c3_96 = arith.constant 3 : index
    %c2_97 = arith.constant 2 : index
    %63 = memref.load %arg1[%c3_96, %c2_97] : memref<30x4xf32, #tpu.memory_space<smem>>
    %c4_98 = arith.constant 4 : index
    %c2_99 = arith.constant 2 : index
    %64 = memref.load %arg1[%c4_98, %c2_99] : memref<30x4xf32, #tpu.memory_space<smem>>
    %c5_100 = arith.constant 5 : index
    %c2_101 = arith.constant 2 : index
    %65 = memref.load %arg1[%c5_100, %c2_101] : memref<30x4xf32, #tpu.memory_space<smem>>
    %c6_102 = arith.constant 6 : index
    %c2_103 = arith.constant 2 : index
    %66 = memref.load %arg1[%c6_102, %c2_103] : memref<30x4xf32, #tpu.memory_space<smem>>
    %c7_104 = arith.constant 7 : index
    %c2_105 = arith.constant 2 : index
    %67 = memref.load %arg1[%c7_104, %c2_105] : memref<30x4xf32, #tpu.memory_space<smem>>
    %c8_106 = arith.constant 8 : index
    %c2_107 = arith.constant 2 : index
    %68 = memref.load %arg1[%c8_106, %c2_107] : memref<30x4xf32, #tpu.memory_space<smem>>
    %c9_108 = arith.constant 9 : index
    %c2_109 = arith.constant 2 : index
    %69 = memref.load %arg1[%c9_108, %c2_109] : memref<30x4xf32, #tpu.memory_space<smem>>
    %c10_110 = arith.constant 10 : index
    %c2_111 = arith.constant 2 : index
    %70 = memref.load %arg1[%c10_110, %c2_111] : memref<30x4xf32, #tpu.memory_space<smem>>
    %c11_112 = arith.constant 11 : index
    %c2_113 = arith.constant 2 : index
    %71 = memref.load %arg1[%c11_112, %c2_113] : memref<30x4xf32, #tpu.memory_space<smem>>
    %c12_114 = arith.constant 12 : index
    %c2_115 = arith.constant 2 : index
    %72 = memref.load %arg1[%c12_114, %c2_115] : memref<30x4xf32, #tpu.memory_space<smem>>
    %c13_116 = arith.constant 13 : index
    %c2_117 = arith.constant 2 : index
    %73 = memref.load %arg1[%c13_116, %c2_117] : memref<30x4xf32, #tpu.memory_space<smem>>
    %c14_118 = arith.constant 14 : index
    %c2_119 = arith.constant 2 : index
    %74 = memref.load %arg1[%c14_118, %c2_119] : memref<30x4xf32, #tpu.memory_space<smem>>
    %c15_120 = arith.constant 15 : index
    %c2_121 = arith.constant 2 : index
    %75 = memref.load %arg1[%c15_120, %c2_121] : memref<30x4xf32, #tpu.memory_space<smem>>
    %c16_122 = arith.constant 16 : index
    %c2_123 = arith.constant 2 : index
    %76 = memref.load %arg1[%c16_122, %c2_123] : memref<30x4xf32, #tpu.memory_space<smem>>
    %c17_124 = arith.constant 17 : index
    %c2_125 = arith.constant 2 : index
    %77 = memref.load %arg1[%c17_124, %c2_125] : memref<30x4xf32, #tpu.memory_space<smem>>
    %c18_126 = arith.constant 18 : index
    %c2_127 = arith.constant 2 : index
    %78 = memref.load %arg1[%c18_126, %c2_127] : memref<30x4xf32, #tpu.memory_space<smem>>
    %c19_128 = arith.constant 19 : index
    %c2_129 = arith.constant 2 : index
    %79 = memref.load %arg1[%c19_128, %c2_129] : memref<30x4xf32, #tpu.memory_space<smem>>
    %c20_130 = arith.constant 20 : index
    %c2_131 = arith.constant 2 : index
    %80 = memref.load %arg1[%c20_130, %c2_131] : memref<30x4xf32, #tpu.memory_space<smem>>
    %c21_132 = arith.constant 21 : index
    %c2_133 = arith.constant 2 : index
    %81 = memref.load %arg1[%c21_132, %c2_133] : memref<30x4xf32, #tpu.memory_space<smem>>
    %c22_134 = arith.constant 22 : index
    %c2_135 = arith.constant 2 : index
    %82 = memref.load %arg1[%c22_134, %c2_135] : memref<30x4xf32, #tpu.memory_space<smem>>
    %c23_136 = arith.constant 23 : index
    %c2_137 = arith.constant 2 : index
    %83 = memref.load %arg1[%c23_136, %c2_137] : memref<30x4xf32, #tpu.memory_space<smem>>
    %c24_138 = arith.constant 24 : index
    %c2_139 = arith.constant 2 : index
    %84 = memref.load %arg1[%c24_138, %c2_139] : memref<30x4xf32, #tpu.memory_space<smem>>
    %c25_140 = arith.constant 25 : index
    %c2_141 = arith.constant 2 : index
    %85 = memref.load %arg1[%c25_140, %c2_141] : memref<30x4xf32, #tpu.memory_space<smem>>
    %c26_142 = arith.constant 26 : index
    %c2_143 = arith.constant 2 : index
    %86 = memref.load %arg1[%c26_142, %c2_143] : memref<30x4xf32, #tpu.memory_space<smem>>
    %c27_144 = arith.constant 27 : index
    %c2_145 = arith.constant 2 : index
    %87 = memref.load %arg1[%c27_144, %c2_145] : memref<30x4xf32, #tpu.memory_space<smem>>
    %c28_146 = arith.constant 28 : index
    %c2_147 = arith.constant 2 : index
    %88 = memref.load %arg1[%c28_146, %c2_147] : memref<30x4xf32, #tpu.memory_space<smem>>
    %c29_148 = arith.constant 29 : index
    %c2_149 = arith.constant 2 : index
    %89 = memref.load %arg1[%c29_148, %c2_149] : memref<30x4xf32, #tpu.memory_space<smem>>
    %c0_150 = arith.constant 0 : index
    %c3_151 = arith.constant 3 : index
    %90 = memref.load %arg1[%c0_150, %c3_151] : memref<30x4xf32, #tpu.memory_space<smem>>
    %c1_152 = arith.constant 1 : index
    %c3_153 = arith.constant 3 : index
    %91 = memref.load %arg1[%c1_152, %c3_153] : memref<30x4xf32, #tpu.memory_space<smem>>
    %c2_154 = arith.constant 2 : index
    %c3_155 = arith.constant 3 : index
    %92 = memref.load %arg1[%c2_154, %c3_155] : memref<30x4xf32, #tpu.memory_space<smem>>
    %c3_156 = arith.constant 3 : index
    %c3_157 = arith.constant 3 : index
    %93 = memref.load %arg1[%c3_156, %c3_157] : memref<30x4xf32, #tpu.memory_space<smem>>
    %c4_158 = arith.constant 4 : index
    %c3_159 = arith.constant 3 : index
    %94 = memref.load %arg1[%c4_158, %c3_159] : memref<30x4xf32, #tpu.memory_space<smem>>
    %c5_160 = arith.constant 5 : index
    %c3_161 = arith.constant 3 : index
    %95 = memref.load %arg1[%c5_160, %c3_161] : memref<30x4xf32, #tpu.memory_space<smem>>
    %c6_162 = arith.constant 6 : index
    %c3_163 = arith.constant 3 : index
    %96 = memref.load %arg1[%c6_162, %c3_163] : memref<30x4xf32, #tpu.memory_space<smem>>
    %c7_164 = arith.constant 7 : index
    %c3_165 = arith.constant 3 : index
    %97 = memref.load %arg1[%c7_164, %c3_165] : memref<30x4xf32, #tpu.memory_space<smem>>
    %c8_166 = arith.constant 8 : index
    %c3_167 = arith.constant 3 : index
    %98 = memref.load %arg1[%c8_166, %c3_167] : memref<30x4xf32, #tpu.memory_space<smem>>
    %c9_168 = arith.constant 9 : index
    %c3_169 = arith.constant 3 : index
    %99 = memref.load %arg1[%c9_168, %c3_169] : memref<30x4xf32, #tpu.memory_space<smem>>
    %c10_170 = arith.constant 10 : index
    %c3_171 = arith.constant 3 : index
    %100 = memref.load %arg1[%c10_170, %c3_171] : memref<30x4xf32, #tpu.memory_space<smem>>
    %c11_172 = arith.constant 11 : index
    %c3_173 = arith.constant 3 : index
    %101 = memref.load %arg1[%c11_172, %c3_173] : memref<30x4xf32, #tpu.memory_space<smem>>
    %c12_174 = arith.constant 12 : index
    %c3_175 = arith.constant 3 : index
    %102 = memref.load %arg1[%c12_174, %c3_175] : memref<30x4xf32, #tpu.memory_space<smem>>
    %c13_176 = arith.constant 13 : index
    %c3_177 = arith.constant 3 : index
    %103 = memref.load %arg1[%c13_176, %c3_177] : memref<30x4xf32, #tpu.memory_space<smem>>
    %c14_178 = arith.constant 14 : index
    %c3_179 = arith.constant 3 : index
    %104 = memref.load %arg1[%c14_178, %c3_179] : memref<30x4xf32, #tpu.memory_space<smem>>
    %c15_180 = arith.constant 15 : index
    %c3_181 = arith.constant 3 : index
    %105 = memref.load %arg1[%c15_180, %c3_181] : memref<30x4xf32, #tpu.memory_space<smem>>
    %c16_182 = arith.constant 16 : index
    %c3_183 = arith.constant 3 : index
    %106 = memref.load %arg1[%c16_182, %c3_183] : memref<30x4xf32, #tpu.memory_space<smem>>
    %c17_184 = arith.constant 17 : index
    %c3_185 = arith.constant 3 : index
    %107 = memref.load %arg1[%c17_184, %c3_185] : memref<30x4xf32, #tpu.memory_space<smem>>
    %c18_186 = arith.constant 18 : index
    %c3_187 = arith.constant 3 : index
    %108 = memref.load %arg1[%c18_186, %c3_187] : memref<30x4xf32, #tpu.memory_space<smem>>
    %c19_188 = arith.constant 19 : index
    %c3_189 = arith.constant 3 : index
    %109 = memref.load %arg1[%c19_188, %c3_189] : memref<30x4xf32, #tpu.memory_space<smem>>
    %c20_190 = arith.constant 20 : index
    %c3_191 = arith.constant 3 : index
    %110 = memref.load %arg1[%c20_190, %c3_191] : memref<30x4xf32, #tpu.memory_space<smem>>
    %c21_192 = arith.constant 21 : index
    %c3_193 = arith.constant 3 : index
    %111 = memref.load %arg1[%c21_192, %c3_193] : memref<30x4xf32, #tpu.memory_space<smem>>
    %c22_194 = arith.constant 22 : index
    %c3_195 = arith.constant 3 : index
    %112 = memref.load %arg1[%c22_194, %c3_195] : memref<30x4xf32, #tpu.memory_space<smem>>
    %c23_196 = arith.constant 23 : index
    %c3_197 = arith.constant 3 : index
    %113 = memref.load %arg1[%c23_196, %c3_197] : memref<30x4xf32, #tpu.memory_space<smem>>
    %c24_198 = arith.constant 24 : index
    %c3_199 = arith.constant 3 : index
    %114 = memref.load %arg1[%c24_198, %c3_199] : memref<30x4xf32, #tpu.memory_space<smem>>
    %c25_200 = arith.constant 25 : index
    %c3_201 = arith.constant 3 : index
    %115 = memref.load %arg1[%c25_200, %c3_201] : memref<30x4xf32, #tpu.memory_space<smem>>
    %c26_202 = arith.constant 26 : index
    %c3_203 = arith.constant 3 : index
    %116 = memref.load %arg1[%c26_202, %c3_203] : memref<30x4xf32, #tpu.memory_space<smem>>
    %c27_204 = arith.constant 27 : index
    %c3_205 = arith.constant 3 : index
    %117 = memref.load %arg1[%c27_204, %c3_205] : memref<30x4xf32, #tpu.memory_space<smem>>
    %c28_206 = arith.constant 28 : index
    %c3_207 = arith.constant 3 : index
    %118 = memref.load %arg1[%c28_206, %c3_207] : memref<30x4xf32, #tpu.memory_space<smem>>
    %c29_208 = arith.constant 29 : index
    %c3_209 = arith.constant 3 : index
    %119 = memref.load %arg1[%c29_208, %c3_209] : memref<30x4xf32, #tpu.memory_space<smem>>
    %cst = arith.constant 0.000000e+00 : f32
    %120 = vector.broadcast %cst : f32 to vector<32x128xf32>
    %c0_i32 = arith.constant 0 : i32
    %c32_i32 = arith.constant 32 : i32
    %121 = arith.muli %c0_i32, %c32_i32 : i32
    %122 = tpu.assume_multiple %121, 32 : i32
    %c0_210 = arith.constant 0 : index
    %123 = arith.index_cast %122 : i32 to index
    %c0_211 = arith.constant 0 : index
    %124 = vector.load %arg2[%c0_210, %123, %c0_211] : memref<3x32x128xf32, #tpu.memory_space<vmem>>, vector<1x32x128xf32>
    %125 = vector.shape_cast %124 : vector<1x32x128xf32> to vector<32x128xf32>
    %c1_212 = arith.constant 1 : index
    %126 = arith.index_cast %122 : i32 to index
    %c0_213 = arith.constant 0 : index
    %127 = vector.load %arg2[%c1_212, %126, %c0_213] : memref<3x32x128xf32, #tpu.memory_space<vmem>>, vector<1x32x128xf32>
    %128 = vector.shape_cast %127 : vector<1x32x128xf32> to vector<32x128xf32>
    %c2_214 = arith.constant 2 : index
    %129 = arith.index_cast %122 : i32 to index
    %c0_215 = arith.constant 0 : index
    %130 = vector.load %arg2[%c2_214, %129, %c0_215] : memref<3x32x128xf32, #tpu.memory_space<vmem>>, vector<1x32x128xf32>
    %131 = vector.shape_cast %130 : vector<1x32x128xf32> to vector<32x128xf32>
    %132 = arith.mulf %125, %125 : vector<32x128xf32>
    %133 = arith.mulf %128, %128 : vector<32x128xf32>
    %134 = arith.addf %132, %133 : vector<32x128xf32>
    %135 = arith.mulf %131, %131 : vector<32x128xf32>
    %136 = arith.addf %134, %135 : vector<32x128xf32>
    %137 = vector.broadcast %0 : f32 to vector<32x128xf32>
    %138 = arith.mulf %125, %137 : vector<32x128xf32>
    %139 = vector.broadcast %30 : f32 to vector<32x128xf32>
    %140 = arith.mulf %128, %139 : vector<32x128xf32>
    %141 = arith.addf %138, %140 : vector<32x128xf32>
    %142 = vector.broadcast %60 : f32 to vector<32x128xf32>
    %143 = arith.mulf %131, %142 : vector<32x128xf32>
    %144 = arith.addf %141, %143 : vector<32x128xf32>
    %145 = vector.broadcast %90 : f32 to vector<32x128xf32>
    %146 = arith.addf %144, %145 : vector<32x128xf32>
    %147 = vector.broadcast %1 : f32 to vector<32x128xf32>
    %148 = arith.mulf %125, %147 : vector<32x128xf32>
    %149 = vector.broadcast %31 : f32 to vector<32x128xf32>
    %150 = arith.mulf %128, %149 : vector<32x128xf32>
    %151 = arith.addf %148, %150 : vector<32x128xf32>
    %152 = vector.broadcast %61 : f32 to vector<32x128xf32>
    %153 = arith.mulf %131, %152 : vector<32x128xf32>
    %154 = arith.addf %151, %153 : vector<32x128xf32>
    %155 = vector.broadcast %91 : f32 to vector<32x128xf32>
    %156 = arith.addf %154, %155 : vector<32x128xf32>
    %157 = arith.minimumf %146, %156 : vector<32x128xf32>
    %158 = vector.broadcast %2 : f32 to vector<32x128xf32>
    %159 = arith.mulf %125, %158 : vector<32x128xf32>
    %160 = vector.broadcast %32 : f32 to vector<32x128xf32>
    %161 = arith.mulf %128, %160 : vector<32x128xf32>
    %162 = arith.addf %159, %161 : vector<32x128xf32>
    %163 = vector.broadcast %62 : f32 to vector<32x128xf32>
    %164 = arith.mulf %131, %163 : vector<32x128xf32>
    %165 = arith.addf %162, %164 : vector<32x128xf32>
    %166 = vector.broadcast %92 : f32 to vector<32x128xf32>
    %167 = arith.addf %165, %166 : vector<32x128xf32>
    %168 = arith.minimumf %157, %167 : vector<32x128xf32>
    %169 = vector.broadcast %3 : f32 to vector<32x128xf32>
    %170 = arith.mulf %125, %169 : vector<32x128xf32>
    %171 = vector.broadcast %33 : f32 to vector<32x128xf32>
    %172 = arith.mulf %128, %171 : vector<32x128xf32>
    %173 = arith.addf %170, %172 : vector<32x128xf32>
    %174 = vector.broadcast %63 : f32 to vector<32x128xf32>
    %175 = arith.mulf %131, %174 : vector<32x128xf32>
    %176 = arith.addf %173, %175 : vector<32x128xf32>
    %177 = vector.broadcast %93 : f32 to vector<32x128xf32>
    %178 = arith.addf %176, %177 : vector<32x128xf32>
    %179 = arith.minimumf %168, %178 : vector<32x128xf32>
    %180 = vector.broadcast %4 : f32 to vector<32x128xf32>
    %181 = arith.mulf %125, %180 : vector<32x128xf32>
    %182 = vector.broadcast %34 : f32 to vector<32x128xf32>
    %183 = arith.mulf %128, %182 : vector<32x128xf32>
    %184 = arith.addf %181, %183 : vector<32x128xf32>
    %185 = vector.broadcast %64 : f32 to vector<32x128xf32>
    %186 = arith.mulf %131, %185 : vector<32x128xf32>
    %187 = arith.addf %184, %186 : vector<32x128xf32>
    %188 = vector.broadcast %94 : f32 to vector<32x128xf32>
    %189 = arith.addf %187, %188 : vector<32x128xf32>
    %190 = arith.minimumf %179, %189 : vector<32x128xf32>
    %191 = vector.broadcast %5 : f32 to vector<32x128xf32>
    %192 = arith.mulf %125, %191 : vector<32x128xf32>
    %193 = vector.broadcast %35 : f32 to vector<32x128xf32>
    %194 = arith.mulf %128, %193 : vector<32x128xf32>
    %195 = arith.addf %192, %194 : vector<32x128xf32>
    %196 = vector.broadcast %65 : f32 to vector<32x128xf32>
    %197 = arith.mulf %131, %196 : vector<32x128xf32>
    %198 = arith.addf %195, %197 : vector<32x128xf32>
    %199 = vector.broadcast %95 : f32 to vector<32x128xf32>
    %200 = arith.addf %198, %199 : vector<32x128xf32>
    %201 = arith.minimumf %190, %200 : vector<32x128xf32>
    %202 = vector.broadcast %6 : f32 to vector<32x128xf32>
    %203 = arith.mulf %125, %202 : vector<32x128xf32>
    %204 = vector.broadcast %36 : f32 to vector<32x128xf32>
    %205 = arith.mulf %128, %204 : vector<32x128xf32>
    %206 = arith.addf %203, %205 : vector<32x128xf32>
    %207 = vector.broadcast %66 : f32 to vector<32x128xf32>
    %208 = arith.mulf %131, %207 : vector<32x128xf32>
    %209 = arith.addf %206, %208 : vector<32x128xf32>
    %210 = vector.broadcast %96 : f32 to vector<32x128xf32>
    %211 = arith.addf %209, %210 : vector<32x128xf32>
    %212 = arith.minimumf %201, %211 : vector<32x128xf32>
    %213 = vector.broadcast %7 : f32 to vector<32x128xf32>
    %214 = arith.mulf %125, %213 : vector<32x128xf32>
    %215 = vector.broadcast %37 : f32 to vector<32x128xf32>
    %216 = arith.mulf %128, %215 : vector<32x128xf32>
    %217 = arith.addf %214, %216 : vector<32x128xf32>
    %218 = vector.broadcast %67 : f32 to vector<32x128xf32>
    %219 = arith.mulf %131, %218 : vector<32x128xf32>
    %220 = arith.addf %217, %219 : vector<32x128xf32>
    %221 = vector.broadcast %97 : f32 to vector<32x128xf32>
    %222 = arith.addf %220, %221 : vector<32x128xf32>
    %223 = arith.minimumf %212, %222 : vector<32x128xf32>
    %224 = vector.broadcast %8 : f32 to vector<32x128xf32>
    %225 = arith.mulf %125, %224 : vector<32x128xf32>
    %226 = vector.broadcast %38 : f32 to vector<32x128xf32>
    %227 = arith.mulf %128, %226 : vector<32x128xf32>
    %228 = arith.addf %225, %227 : vector<32x128xf32>
    %229 = vector.broadcast %68 : f32 to vector<32x128xf32>
    %230 = arith.mulf %131, %229 : vector<32x128xf32>
    %231 = arith.addf %228, %230 : vector<32x128xf32>
    %232 = vector.broadcast %98 : f32 to vector<32x128xf32>
    %233 = arith.addf %231, %232 : vector<32x128xf32>
    %234 = arith.minimumf %223, %233 : vector<32x128xf32>
    %235 = vector.broadcast %9 : f32 to vector<32x128xf32>
    %236 = arith.mulf %125, %235 : vector<32x128xf32>
    %237 = vector.broadcast %39 : f32 to vector<32x128xf32>
    %238 = arith.mulf %128, %237 : vector<32x128xf32>
    %239 = arith.addf %236, %238 : vector<32x128xf32>
    %240 = vector.broadcast %69 : f32 to vector<32x128xf32>
    %241 = arith.mulf %131, %240 : vector<32x128xf32>
    %242 = arith.addf %239, %241 : vector<32x128xf32>
    %243 = vector.broadcast %99 : f32 to vector<32x128xf32>
    %244 = arith.addf %242, %243 : vector<32x128xf32>
    %245 = arith.minimumf %234, %244 : vector<32x128xf32>
    %246 = vector.broadcast %10 : f32 to vector<32x128xf32>
    %247 = arith.mulf %125, %246 : vector<32x128xf32>
    %248 = vector.broadcast %40 : f32 to vector<32x128xf32>
    %249 = arith.mulf %128, %248 : vector<32x128xf32>
    %250 = arith.addf %247, %249 : vector<32x128xf32>
    %251 = vector.broadcast %70 : f32 to vector<32x128xf32>
    %252 = arith.mulf %131, %251 : vector<32x128xf32>
    %253 = arith.addf %250, %252 : vector<32x128xf32>
    %254 = vector.broadcast %100 : f32 to vector<32x128xf32>
    %255 = arith.addf %253, %254 : vector<32x128xf32>
    %256 = arith.minimumf %245, %255 : vector<32x128xf32>
    %257 = vector.broadcast %11 : f32 to vector<32x128xf32>
    %258 = arith.mulf %125, %257 : vector<32x128xf32>
    %259 = vector.broadcast %41 : f32 to vector<32x128xf32>
    %260 = arith.mulf %128, %259 : vector<32x128xf32>
    %261 = arith.addf %258, %260 : vector<32x128xf32>
    %262 = vector.broadcast %71 : f32 to vector<32x128xf32>
    %263 = arith.mulf %131, %262 : vector<32x128xf32>
    %264 = arith.addf %261, %263 : vector<32x128xf32>
    %265 = vector.broadcast %101 : f32 to vector<32x128xf32>
    %266 = arith.addf %264, %265 : vector<32x128xf32>
    %267 = arith.minimumf %256, %266 : vector<32x128xf32>
    %268 = vector.broadcast %12 : f32 to vector<32x128xf32>
    %269 = arith.mulf %125, %268 : vector<32x128xf32>
    %270 = vector.broadcast %42 : f32 to vector<32x128xf32>
    %271 = arith.mulf %128, %270 : vector<32x128xf32>
    %272 = arith.addf %269, %271 : vector<32x128xf32>
    %273 = vector.broadcast %72 : f32 to vector<32x128xf32>
    %274 = arith.mulf %131, %273 : vector<32x128xf32>
    %275 = arith.addf %272, %274 : vector<32x128xf32>
    %276 = vector.broadcast %102 : f32 to vector<32x128xf32>
    %277 = arith.addf %275, %276 : vector<32x128xf32>
    %278 = arith.minimumf %267, %277 : vector<32x128xf32>
    %279 = vector.broadcast %13 : f32 to vector<32x128xf32>
    %280 = arith.mulf %125, %279 : vector<32x128xf32>
    %281 = vector.broadcast %43 : f32 to vector<32x128xf32>
    %282 = arith.mulf %128, %281 : vector<32x128xf32>
    %283 = arith.addf %280, %282 : vector<32x128xf32>
    %284 = vector.broadcast %73 : f32 to vector<32x128xf32>
    %285 = arith.mulf %131, %284 : vector<32x128xf32>
    %286 = arith.addf %283, %285 : vector<32x128xf32>
    %287 = vector.broadcast %103 : f32 to vector<32x128xf32>
    %288 = arith.addf %286, %287 : vector<32x128xf32>
    %289 = arith.minimumf %278, %288 : vector<32x128xf32>
    %290 = vector.broadcast %14 : f32 to vector<32x128xf32>
    %291 = arith.mulf %125, %290 : vector<32x128xf32>
    %292 = vector.broadcast %44 : f32 to vector<32x128xf32>
    %293 = arith.mulf %128, %292 : vector<32x128xf32>
    %294 = arith.addf %291, %293 : vector<32x128xf32>
    %295 = vector.broadcast %74 : f32 to vector<32x128xf32>
    %296 = arith.mulf %131, %295 : vector<32x128xf32>
    %297 = arith.addf %294, %296 : vector<32x128xf32>
    %298 = vector.broadcast %104 : f32 to vector<32x128xf32>
    %299 = arith.addf %297, %298 : vector<32x128xf32>
    %300 = arith.minimumf %289, %299 : vector<32x128xf32>
    %301 = vector.broadcast %15 : f32 to vector<32x128xf32>
    %302 = arith.mulf %125, %301 : vector<32x128xf32>
    %303 = vector.broadcast %45 : f32 to vector<32x128xf32>
    %304 = arith.mulf %128, %303 : vector<32x128xf32>
    %305 = arith.addf %302, %304 : vector<32x128xf32>
    %306 = vector.broadcast %75 : f32 to vector<32x128xf32>
    %307 = arith.mulf %131, %306 : vector<32x128xf32>
    %308 = arith.addf %305, %307 : vector<32x128xf32>
    %309 = vector.broadcast %105 : f32 to vector<32x128xf32>
    %310 = arith.addf %308, %309 : vector<32x128xf32>
    %311 = arith.minimumf %300, %310 : vector<32x128xf32>
    %312 = vector.broadcast %16 : f32 to vector<32x128xf32>
    %313 = arith.mulf %125, %312 : vector<32x128xf32>
    %314 = vector.broadcast %46 : f32 to vector<32x128xf32>
    %315 = arith.mulf %128, %314 : vector<32x128xf32>
    %316 = arith.addf %313, %315 : vector<32x128xf32>
    %317 = vector.broadcast %76 : f32 to vector<32x128xf32>
    %318 = arith.mulf %131, %317 : vector<32x128xf32>
    %319 = arith.addf %316, %318 : vector<32x128xf32>
    %320 = vector.broadcast %106 : f32 to vector<32x128xf32>
    %321 = arith.addf %319, %320 : vector<32x128xf32>
    %322 = arith.minimumf %311, %321 : vector<32x128xf32>
    %323 = vector.broadcast %17 : f32 to vector<32x128xf32>
    %324 = arith.mulf %125, %323 : vector<32x128xf32>
    %325 = vector.broadcast %47 : f32 to vector<32x128xf32>
    %326 = arith.mulf %128, %325 : vector<32x128xf32>
    %327 = arith.addf %324, %326 : vector<32x128xf32>
    %328 = vector.broadcast %77 : f32 to vector<32x128xf32>
    %329 = arith.mulf %131, %328 : vector<32x128xf32>
    %330 = arith.addf %327, %329 : vector<32x128xf32>
    %331 = vector.broadcast %107 : f32 to vector<32x128xf32>
    %332 = arith.addf %330, %331 : vector<32x128xf32>
    %333 = arith.minimumf %322, %332 : vector<32x128xf32>
    %334 = vector.broadcast %18 : f32 to vector<32x128xf32>
    %335 = arith.mulf %125, %334 : vector<32x128xf32>
    %336 = vector.broadcast %48 : f32 to vector<32x128xf32>
    %337 = arith.mulf %128, %336 : vector<32x128xf32>
    %338 = arith.addf %335, %337 : vector<32x128xf32>
    %339 = vector.broadcast %78 : f32 to vector<32x128xf32>
    %340 = arith.mulf %131, %339 : vector<32x128xf32>
    %341 = arith.addf %338, %340 : vector<32x128xf32>
    %342 = vector.broadcast %108 : f32 to vector<32x128xf32>
    %343 = arith.addf %341, %342 : vector<32x128xf32>
    %344 = arith.minimumf %333, %343 : vector<32x128xf32>
    %345 = vector.broadcast %19 : f32 to vector<32x128xf32>
    %346 = arith.mulf %125, %345 : vector<32x128xf32>
    %347 = vector.broadcast %49 : f32 to vector<32x128xf32>
    %348 = arith.mulf %128, %347 : vector<32x128xf32>
    %349 = arith.addf %346, %348 : vector<32x128xf32>
    %350 = vector.broadcast %79 : f32 to vector<32x128xf32>
    %351 = arith.mulf %131, %350 : vector<32x128xf32>
    %352 = arith.addf %349, %351 : vector<32x128xf32>
    %353 = vector.broadcast %109 : f32 to vector<32x128xf32>
    %354 = arith.addf %352, %353 : vector<32x128xf32>
    %355 = arith.minimumf %344, %354 : vector<32x128xf32>
    %356 = vector.broadcast %20 : f32 to vector<32x128xf32>
    %357 = arith.mulf %125, %356 : vector<32x128xf32>
    %358 = vector.broadcast %50 : f32 to vector<32x128xf32>
    %359 = arith.mulf %128, %358 : vector<32x128xf32>
    %360 = arith.addf %357, %359 : vector<32x128xf32>
    %361 = vector.broadcast %80 : f32 to vector<32x128xf32>
    %362 = arith.mulf %131, %361 : vector<32x128xf32>
    %363 = arith.addf %360, %362 : vector<32x128xf32>
    %364 = vector.broadcast %110 : f32 to vector<32x128xf32>
    %365 = arith.addf %363, %364 : vector<32x128xf32>
    %366 = arith.minimumf %355, %365 : vector<32x128xf32>
    %367 = vector.broadcast %21 : f32 to vector<32x128xf32>
    %368 = arith.mulf %125, %367 : vector<32x128xf32>
    %369 = vector.broadcast %51 : f32 to vector<32x128xf32>
    %370 = arith.mulf %128, %369 : vector<32x128xf32>
    %371 = arith.addf %368, %370 : vector<32x128xf32>
    %372 = vector.broadcast %81 : f32 to vector<32x128xf32>
    %373 = arith.mulf %131, %372 : vector<32x128xf32>
    %374 = arith.addf %371, %373 : vector<32x128xf32>
    %375 = vector.broadcast %111 : f32 to vector<32x128xf32>
    %376 = arith.addf %374, %375 : vector<32x128xf32>
    %377 = arith.minimumf %366, %376 : vector<32x128xf32>
    %378 = vector.broadcast %22 : f32 to vector<32x128xf32>
    %379 = arith.mulf %125, %378 : vector<32x128xf32>
    %380 = vector.broadcast %52 : f32 to vector<32x128xf32>
    %381 = arith.mulf %128, %380 : vector<32x128xf32>
    %382 = arith.addf %379, %381 : vector<32x128xf32>
    %383 = vector.broadcast %82 : f32 to vector<32x128xf32>
    %384 = arith.mulf %131, %383 : vector<32x128xf32>
    %385 = arith.addf %382, %384 : vector<32x128xf32>
    %386 = vector.broadcast %112 : f32 to vector<32x128xf32>
    %387 = arith.addf %385, %386 : vector<32x128xf32>
    %388 = arith.minimumf %377, %387 : vector<32x128xf32>
    %389 = vector.broadcast %23 : f32 to vector<32x128xf32>
    %390 = arith.mulf %125, %389 : vector<32x128xf32>
    %391 = vector.broadcast %53 : f32 to vector<32x128xf32>
    %392 = arith.mulf %128, %391 : vector<32x128xf32>
    %393 = arith.addf %390, %392 : vector<32x128xf32>
    %394 = vector.broadcast %83 : f32 to vector<32x128xf32>
    %395 = arith.mulf %131, %394 : vector<32x128xf32>
    %396 = arith.addf %393, %395 : vector<32x128xf32>
    %397 = vector.broadcast %113 : f32 to vector<32x128xf32>
    %398 = arith.addf %396, %397 : vector<32x128xf32>
    %399 = arith.minimumf %388, %398 : vector<32x128xf32>
    %400 = vector.broadcast %24 : f32 to vector<32x128xf32>
    %401 = arith.mulf %125, %400 : vector<32x128xf32>
    %402 = vector.broadcast %54 : f32 to vector<32x128xf32>
    %403 = arith.mulf %128, %402 : vector<32x128xf32>
    %404 = arith.addf %401, %403 : vector<32x128xf32>
    %405 = vector.broadcast %84 : f32 to vector<32x128xf32>
    %406 = arith.mulf %131, %405 : vector<32x128xf32>
    %407 = arith.addf %404, %406 : vector<32x128xf32>
    %408 = vector.broadcast %114 : f32 to vector<32x128xf32>
    %409 = arith.addf %407, %408 : vector<32x128xf32>
    %410 = arith.minimumf %399, %409 : vector<32x128xf32>
    %411 = vector.broadcast %25 : f32 to vector<32x128xf32>
    %412 = arith.mulf %125, %411 : vector<32x128xf32>
    %413 = vector.broadcast %55 : f32 to vector<32x128xf32>
    %414 = arith.mulf %128, %413 : vector<32x128xf32>
    %415 = arith.addf %412, %414 : vector<32x128xf32>
    %416 = vector.broadcast %85 : f32 to vector<32x128xf32>
    %417 = arith.mulf %131, %416 : vector<32x128xf32>
    %418 = arith.addf %415, %417 : vector<32x128xf32>
    %419 = vector.broadcast %115 : f32 to vector<32x128xf32>
    %420 = arith.addf %418, %419 : vector<32x128xf32>
    %421 = arith.minimumf %410, %420 : vector<32x128xf32>
    %422 = vector.broadcast %26 : f32 to vector<32x128xf32>
    %423 = arith.mulf %125, %422 : vector<32x128xf32>
    %424 = vector.broadcast %56 : f32 to vector<32x128xf32>
    %425 = arith.mulf %128, %424 : vector<32x128xf32>
    %426 = arith.addf %423, %425 : vector<32x128xf32>
    %427 = vector.broadcast %86 : f32 to vector<32x128xf32>
    %428 = arith.mulf %131, %427 : vector<32x128xf32>
    %429 = arith.addf %426, %428 : vector<32x128xf32>
    %430 = vector.broadcast %116 : f32 to vector<32x128xf32>
    %431 = arith.addf %429, %430 : vector<32x128xf32>
    %432 = arith.minimumf %421, %431 : vector<32x128xf32>
    %433 = vector.broadcast %27 : f32 to vector<32x128xf32>
    %434 = arith.mulf %125, %433 : vector<32x128xf32>
    %435 = vector.broadcast %57 : f32 to vector<32x128xf32>
    %436 = arith.mulf %128, %435 : vector<32x128xf32>
    %437 = arith.addf %434, %436 : vector<32x128xf32>
    %438 = vector.broadcast %87 : f32 to vector<32x128xf32>
    %439 = arith.mulf %131, %438 : vector<32x128xf32>
    %440 = arith.addf %437, %439 : vector<32x128xf32>
    %441 = vector.broadcast %117 : f32 to vector<32x128xf32>
    %442 = arith.addf %440, %441 : vector<32x128xf32>
    %443 = arith.minimumf %432, %442 : vector<32x128xf32>
    %444 = vector.broadcast %28 : f32 to vector<32x128xf32>
    %445 = arith.mulf %125, %444 : vector<32x128xf32>
    %446 = vector.broadcast %58 : f32 to vector<32x128xf32>
    %447 = arith.mulf %128, %446 : vector<32x128xf32>
    %448 = arith.addf %445, %447 : vector<32x128xf32>
    %449 = vector.broadcast %88 : f32 to vector<32x128xf32>
    %450 = arith.mulf %131, %449 : vector<32x128xf32>
    %451 = arith.addf %448, %450 : vector<32x128xf32>
    %452 = vector.broadcast %118 : f32 to vector<32x128xf32>
    %453 = arith.addf %451, %452 : vector<32x128xf32>
    %454 = arith.minimumf %443, %453 : vector<32x128xf32>
    %455 = vector.broadcast %29 : f32 to vector<32x128xf32>
    %456 = arith.mulf %125, %455 : vector<32x128xf32>
    %457 = vector.broadcast %59 : f32 to vector<32x128xf32>
    %458 = arith.mulf %128, %457 : vector<32x128xf32>
    %459 = arith.addf %456, %458 : vector<32x128xf32>
    %460 = vector.broadcast %89 : f32 to vector<32x128xf32>
    %461 = arith.mulf %131, %460 : vector<32x128xf32>
    %462 = arith.addf %459, %461 : vector<32x128xf32>
    %463 = vector.broadcast %119 : f32 to vector<32x128xf32>
    %464 = arith.addf %462, %463 : vector<32x128xf32>
    %465 = arith.minimumf %454, %464 : vector<32x128xf32>
    %466 = arith.addf %136, %465 : vector<32x128xf32>
    %cst_216 = arith.constant 0.000000e+00 : f32
    %467 = vector.broadcast %cst_216 : f32 to vector<32x128xf32>
    %468 = arith.maximumf %466, %467 : vector<32x128xf32>
    %469 = math.sqrt %468 : vector<32x128xf32>
    %470 = arith.addf %120, %469 : vector<32x128xf32>
    %c1_i32 = arith.constant 1 : i32
    %c0_217 = arith.constant 0 : index
    %c0_218 = arith.constant 0 : index
    %471 = vector.load %arg3[%c0_217, %c0_218] : memref<32x128xf32, #tpu.memory_space<vmem>>, vector<32x128xf32>
    tpu.vector_store %arg3[%c0_217, %c0_218], %470 {strides = array<i32>} : memref<32x128xf32, #tpu.memory_space<vmem>>, vector<32x128xf32>,
    return
  }
  func.func @transform_0(%arg0: i32) -> (i32, i32) {
    %c0_i32 = arith.constant 0 : i32
    %c0_i32_0 = arith.constant 0 : i32
    %c0_i32_1 = arith.constant 0 : i32
    return %c0_i32, %c0_i32_0 : i32, i32
  }
  func.func @transform_1(%arg0: i32) -> (i32, i32, i32) {
    %c0_i32 = arith.constant 0 : i32
    %c0_i32_0 = arith.constant 0 : i32
    %c0_i32_1 = arith.constant 0 : i32
    return %c0_i32, %arg0, %c0_i32_0 : i32, i32, i32
  }
  func.func @transform_2(%arg0: i32) -> (i32, i32) {
    %c0_i32 = arith.constant 0 : i32
    %c0_i32_0 = arith.constant 0 : i32
    return %arg0, %c0_i32 : i32, i32
  }
}

</mosaic_0001>

<bundles_post_ra>
// kernel: tpu_custom_call.1
= control target key start
LH: loop header
LB: loop body
LE: loop exit
PB: predicated region body
PF: predicated region fallthrough
CT: control target
= control target key end

     0   :  { %7 = vsyncpa [#allocation5], 0  ;;  %s2521_s0 = inlined_call_operand.vmem [shape: f32[30,4], index: 0, kind: input, shape index: {}]   ;;  %s2522_s1 = inlined_call_operand.hbm [shape: f32[3,32,128], index: 1, kind: input, shape index: {}]   ;;  %s2523_s2 = inlined_call_operand.hbm [shape: f32[32,128], index: 2, kind: output, shape index: {}]  }
   0x1   :  { %8 = vsyncpa [#allocation3], 0 }
   0x2   :  { %9 = vsyncpa [#allocation4], 0  ;;  %s14_s11 = sshll.u32 %s2521_s0, 4  ;;  %s25_s14 = sshll.u32 %s2522_s1, 4  ;;  %s15_s11 = int_to_ptr.vmem [resolvable:$true] %s14_s11  ;;  %s26_s14 = int_to_ptr.hbm [resolvable:$true] %s25_s14 }
   0x3   :  { %s1463_s15 = smov [#allocation2]   ;;  %s1464_s16 = smov 128  }
   0x4   :  { %s1465_s17 = smov 8   ;;  %s1466_s18 = smov [#allocation6]  }
   0x5   :  { %20 = dma.vmem_to_smem %s15_s11, 512, %s1463_s15, [#allocation5], %s1464_s16, %s1464_s16, %s1465_s17  }
   0x6   :  { %s27_s19 = sshll.u32 %s1466_s18, 4  ;;  %s28_s19 = int_to_ptr.vmem [resolvable:$true] %s27_s19 }
   0x7   :  { %33 = dma.hbm_to_vmem [thread:$0]  %s26_s14, 1536, %s28_s19, [#allocation3], %s1464_s16, %s1464_s16, %s1465_s17  }
   0x8   :  { %1457 = dma.done.wait [#allocation5], 512  }
   0x9   :  { %1458 = vsyncadd [#allocation5], 4294966784 }
   0xa   :  { %1459 = dma.done.wait [#allocation3], 1536  }
   0xb   :  { %1460 = vsyncadd [#allocation3], 4294965760 }
   0xc   :  { %42 = sfence }
   0xd   :  { %s43_s0 = sld [smem:[#allocation2]]  ;;  %v1499_v0 = vld [vmem:[#allocation6] sm:$0xff]  ;;  %v1501_v1 = vld [vmem:[#allocation6 + $0x8] sm:$0xff]  ;;  %v1503_v2 = vld [vmem:[#allocation6 + $0x10] sm:$0xff] }
   0xe   :  { %s1241_s1 = sld [smem:[#allocation2 + $0x80]]  ;;  %v1507_v6 = vld [vmem:[#allocation6 + $0x18] sm:$0xff]  ;;  %v1509_v7 = vld [vmem:[#allocation6 + $0x20] sm:$0xff]  ;;  %v1511_v8 = vld [vmem:[#allocation6 + $0x28] sm:$0xff] }
   0xf   :  { %s1270_s20 = sld [smem:[#allocation2 + $0x1]]  ;;  %v1515_v10 = vld [vmem:[#allocation6 + $0x30] sm:$0xff]  ;;  %v1517_v11 = vld [vmem:[#allocation6 + $0x38] sm:$0xff]  ;;  %v1535_v26 = vld [vmem:[#allocation6 + $0x40] sm:$0xff] }
  0x10   :  { %s1271_s21 = sld [smem:[#allocation2 + $0x81]]  ;;  %v1541_v29 = vld [vmem:[#allocation6 + $0x48] sm:$0xff]  ;;  %v1543_v30 = vld [vmem:[#allocation6 + $0x50] sm:$0xff]  ;;  %v1545_v31 = vld [vmem:[#allocation6 + $0x58] sm:$0xff] }
  0x11   :  { %s1495_s22 = sld [smem:[#allocation2 + $0x100]] }
  0x12   :  { %s1497_s23 = sld [smem:[#allocation2 + $0x101]] }
  0x13   :  { %v199_v3 = vstv %s43_s0  ;;  %s1505_s24 = sld [smem:[#allocation2 + $0x2]] }
  0x14   :  { %v227_v5 = vstv %s1241_s1  ;;  %s1513_s25 = sld [smem:[#allocation2 + $0x82]]  ;;  %v200_v12 = vmul.f32 %v199_v3, %v1499_v0  ;;  %v201_v13 = vmul.f32 %v199_v3, %v1501_v1  ;;  %v202_v14 = vmul.f32 %v199_v3, %v1503_v2 }
  0x15   :  { %v204_v4 = vstv %s1270_s20  ;;  %v228_v15 = vmul.f32 %v227_v5, %v1499_v0  ;;  %v203_v16 = vmul.f32 %v199_v3, %v1507_v6  ;;  %v229_v21 = vmul.f32 %v227_v5, %v1501_v1  ;;  %s1533_s26 = sld [smem:[#allocation2 + $0x180]] }
  0x16   :  { %v232_v9 = vstv %s1271_s21  ;;  %v205_v17 = vmul.f32 %v204_v4, %v1509_v7  ;;  %v206_v18 = vmul.f32 %v204_v4, %v1511_v8  ;;  %v207_v19 = vmul.f32 %v204_v4, %v1515_v10  ;;  %s1539_s27 = sld [smem:[#allocation2 + $0x102]] }
  0x17   :  { %v208_v20 = vmul.f32 %v204_v4, %v1517_v11  ;;  %v233_v22 = vmul.f32 %v232_v9, %v1509_v7  ;;  %v234_v23 = vmul.f32 %v232_v9, %v1511_v8  ;;  %v230_v24 = vmul.f32 %v227_v5, %v1503_v2  ;;  %s1548_s28 = sld [smem:[#allocation2 + $0x181]] }
  0x18   :  { %v235_v25 = vmul.f32 %v232_v9, %v1515_v10  ;;  %v231_v27 = vmul.f32 %v227_v5, %v1507_v6  ;;  %v236_v28 = vmul.f32 %v232_v9, %v1517_v11  ;;  %v209_v32 = vadd.f32 %v205_v17, %v200_v12  ;;  %s1551_s29 = sld [smem:[#allocation2 + $0x182]] }
  0x19   :  { %v210_v33 = vadd.f32 %v206_v18, %v201_v13  ;;  %v211_v34 = vadd.f32 %v207_v19, %v202_v14  ;;  %v213_v35 = vstv %s1505_s24  ;;  %v212_v36 = vadd.f32 %v208_v20, %v203_v16  ;;  %s1567_s30 = sld [smem:[#allocation2 + $0x200]] }
  0x1a   :  { %v237_v37 = vadd.f32 %v233_v22, %v228_v15  ;;  %v238_v38 = vadd.f32 %v234_v23, %v229_v21  ;;  %v259_v39 = vstv %s1495_s22  ;;  %v214_v40 = vmul.f32 %v213_v35, %v1535_v26  ;;  %s1574_s3 = sld [smem:[#allocation2 + $0x201]] }
  0x1b   :  { %v239_v41 = vadd.f32 %v235_v25, %v230_v24  ;;  %v241_v42 = vstv %s1513_s25  ;;  %v264_v43 = vstv %s1497_s23  ;;  %v215_v44 = vmul.f32 %v213_v35, %v1541_v29  ;;  %s1583_s4 = sld [smem:[#allocation2 + $0x202]] }
  0x1c   :  { %v216_v45 = vmul.f32 %v213_v35, %v1543_v30  ;;  %v217_v46 = vmul.f32 %v213_v35, %v1545_v31  ;;  %v240_v47 = vadd.f32 %v236_v28, %v231_v27  ;;  %v242_v48 = vmul.f32 %v241_v42, %v1535_v26  ;;  %s1598_s5 = sld [smem:[#allocation2 + $0x280]] }
  0x1d   :  { %v243_v49 = vmul.f32 %v241_v42, %v1541_v29  ;;  %v260_v50 = vmul.f32 %v259_v39, %v1499_v0  ;;  %v261_v51 = vmul.f32 %v259_v39, %v1501_v1  ;;  %v244_v52 = vmul.f32 %v241_v42, %v1543_v30  ;;  %s1620_s6 = sld [smem:[#allocation2 + $0x300]] }
  0x1e   :  { %v245_v53 = vmul.f32 %v241_v42, %v1545_v31  ;;  %v262_v54 = vmul.f32 %v259_v39, %v1503_v2  ;;  %v265_v55 = vmul.f32 %v264_v43, %v1509_v7  ;;  %v1569_v56 = vadd.f32 %v214_v40, %v209_v32  ;;  %s1626_s7 = sld [smem:[#allocation2 + $0x281]] }
  0x1f   :  { %v263_v57 = vmul.f32 %v259_v39, %v1507_v6  ;;  %v266_v58 = vmul.f32 %v264_v43, %v1511_v8  ;;  %v267_v59 = vmul.f32 %v264_v43, %v1515_v10  ;;  %v1576_v60 = vadd.f32 %v215_v44, %v210_v33  ;;  %s1632_s8 = sld [smem:[#allocation2 + $0x301]] }
  0x20   :  { %v1578_v61 = vadd.f32 %v216_v45, %v211_v34  ;;  %v1580_v62 = vadd.f32 %v217_v46, %v212_v36  ;;  %v268_v63 = vmul.f32 %v264_v43, %v1517_v11  ;;  %v1585_v3 = vadd.f32 %v242_v48, %v237_v37  ;;  %s1641_s9 = sld [smem:[#allocation2 + $0x282]] }
  0x21   :  { %v1587_v4 = vadd.f32 %v243_v49, %v238_v38  ;;  %v273_v5 = vstv %s1539_s27  ;;  %v291_v9 = vstv %s1533_s26  ;;  %v1591_v12 = vadd.f32 %v244_v52, %v239_v41  ;;  %s1330_s10 = sld [smem:[#allocation2 + $0x3]] }
  0x22   :  { %v1593_v13 = vadd.f32 %v245_v53, %v240_v47  ;;  %v269_v14 = vadd.f32 %v265_v55, %v260_v50  ;;  %v296_v15 = vstv %s1548_s28  ;;  %v270_v16 = vadd.f32 %v266_v58, %v261_v51  ;;  %s1687_s11 = sld [smem:[#allocation2 + $0x83]] }
  0x23   :  { %v271_v17 = vadd.f32 %v267_v59, %v262_v54  ;;  %v274_v18 = vmul.f32 %v273_v5, %v1535_v26  ;;  %v305_v19 = vstv %s1551_s29  ;;  %v292_v20 = vmul.f32 %v291_v9, %v1499_v0  ;;  %s1332_s12 = sld [smem:[#allocation2 + $0x103]] }
  0x24   :  { %v293_v21 = vmul.f32 %v291_v9, %v1501_v1  ;;  %v294_v22 = vmul.f32 %v291_v9, %v1503_v2  ;;  %v295_v23 = vmul.f32 %v291_v9, %v1507_v6  ;;  %v297_v24 = vmul.f32 %v296_v15, %v1509_v7  ;;  %s1705_s13 = sld [smem:[#allocation2 + $0x183]] }
  0x25   :  { %v298_v25 = vmul.f32 %v296_v15, %v1511_v8  ;;  %v299_v27 = vmul.f32 %v296_v15, %v1515_v10  ;;  %v300_v28 = vmul.f32 %v296_v15, %v1517_v11  ;;  %v272_v32 = vadd.f32 %v268_v63, %v263_v57  ;;  %s1711_s14 = sld [smem:[#allocation2 + $0x203]] }
  0x26   :  { %v275_v33 = vmul.f32 %v273_v5, %v1541_v29  ;;  %v276_v34 = vmul.f32 %v273_v5, %v1543_v30  ;;  %v277_v35 = vmul.f32 %v273_v5, %v1545_v31  ;;  %v1611_v36 = vadd.f32 %v274_v18, %v269_v14  ;;  %s1741_s15 = sld [smem:[#allocation2 + $0x283]] }
  0x27   :  { %v306_v37 = vmul.f32 %v305_v19, %v1535_v26  ;;  %v307_v38 = vmul.f32 %v305_v19, %v1541_v29  ;;  %v308_v39 = vmul.f32 %v305_v19, %v1543_v30  ;;  %v301_v40 = vadd.f32 %v297_v24, %v292_v20  ;;  %s1749_s18 = sld [smem:[#allocation2 + $0x380]] }
  0x28   :  { %v309_v41 = vmul.f32 %v305_v19, %v1545_v31  ;;  %v323_v42 = vstv %s1567_s30  ;;  %v328_v43 = vstv %s1574_s3  ;;  %v302_v44 = vadd.f32 %v298_v25, %v293_v21  ;;  %s1751_s19 = sld [smem:[#allocation2 + $0x302]] }
  0x29   :  { %v303_v45 = vadd.f32 %v299_v27, %v294_v22  ;;  %v304_v46 = vadd.f32 %v300_v28, %v295_v23  ;;  %v337_v47 = vstv %s1583_s4  ;;  %v324_v48 = vmul.f32 %v323_v42, %v1499_v0  ;;  %s1754_s0 = sld [smem:[#allocation2 + $0x303]] }
  0x2a   :  { %v325_v49 = vmul.f32 %v323_v42, %v1501_v1  ;;  %v326_v50 = vmul.f32 %v323_v42, %v1503_v2  ;;  %v327_v51 = vmul.f32 %v323_v42, %v1507_v6  ;;  %v329_v52 = vmul.f32 %v328_v43, %v1509_v7  ;;  %s1760_s1 = sld [smem:[#allocation2 + $0x381]] }
  0x2b   :  { %v330_v53 = vmul.f32 %v328_v43, %v1511_v8  ;;  %v331_v54 = vmul.f32 %v328_v43, %v1515_v10  ;;  %v332_v55 = vmul.f32 %v328_v43, %v1517_v11  ;;  %v1634_v57 = vadd.f32 %v275_v33, %v270_v16  ;;  %s1767_s20 = sld [smem:[#allocation2 + $0x382]] }
  0x2c   :  { %v1636_v58 = vadd.f32 %v276_v34, %v271_v17  ;;  %v1638_v59 = vadd.f32 %v277_v35, %v272_v32  ;;  %v355_v63 = vstv %s1598_s5  ;;  %v1643_v5 = vadd.f32 %v306_v37, %v301_v40  ;;  %s1783_s21 = sld [smem:[#allocation2 + $0x383]] }
  0x2d   :  { %v1645_v9 = vadd.f32 %v307_v38, %v302_v44  ;;  %v1647_v14 = vadd.f32 %v308_v39, %v303_v45  ;;  %v1649_v15 = vadd.f32 %v309_v41, %v304_v46  ;;  %v338_v18 = vmul.f32 %v337_v47, %v1535_v26  ;;  %s1788_s22 = sld [smem:[#allocation2 + $0x400]] }
  0x2e   :  { %v339_v16 = vmul.f32 %v337_v47, %v1541_v29  ;;  %v340_v17 = vmul.f32 %v337_v47, %v1543_v30  ;;  %v341_v19 = vmul.f32 %v337_v47, %v1545_v31  ;;  %v333_v20 = vadd.f32 %v329_v52, %v324_v48  ;;  %s1793_s23 = sld [smem:[#allocation2 + $0x401]] }
  0x2f   :  { %v334_v21 = vadd.f32 %v330_v53, %v325_v49  ;;  %v335_v22 = vadd.f32 %v331_v54, %v326_v50  ;;  %v336_v23 = vadd.f32 %v332_v55, %v327_v51  ;;  %v1657_v24 = vmul.f32 %v1499_v0, %v1499_v0  ;;  %s1798_s24 = sld [smem:[#allocation2 + $0x402]] }
  0x30   :  { %v1661_v25 = vmul.f32 %v1501_v1, %v1501_v1  ;;  %v1665_v27 = vmul.f32 %v1503_v2, %v1503_v2  ;;  %v1669_v28 = vmul.f32 %v1507_v6, %v1507_v6  ;;  %v1673_v32 = vmul.f32 %v1509_v7, %v1509_v7  ;;  %s1812_s25 = sld [smem:[#allocation2 + $0x403]] }
  0x31   :  { %v1677_v33 = vmul.f32 %v1511_v8, %v1511_v8  ;;  %v1681_v34 = vmul.f32 %v1515_v10, %v1515_v10  ;;  %v1685_v35 = vmul.f32 %v1517_v11, %v1517_v11  ;;  %v1691_v37 = vmul.f32 %v1535_v26, %v1535_v26  ;;  %s1819_s26 = sld [smem:[#allocation2 + $0x480]] }
  0x32   :  { %2524 = vst [vmem:[#allocation11_spill] sm:$0xff] %v1665_v27  ;;  %v1695_v38 = vmul.f32 %v1541_v29, %v1541_v29  ;;  %v1699_v39 = vmul.f32 %v1543_v30, %v1543_v30  ;;  %v1703_v40 = vmul.f32 %v1545_v31, %v1545_v31  ;;  %v342_v41 = vadd.f32 %v338_v18, %v333_v20  ;;  %s1823_s27 = sld [smem:[#allocation2 + $0x481]] }
  0x33   :  { %2525 = vst [vmem:[#allocation12_spill] sm:$0xff] %v1669_v28  ;;  %v343_v42 = vadd.f32 %v339_v16, %v334_v21  ;;  %v344_v43 = vadd.f32 %v340_v17, %v335_v22  ;;  %v345_v44 = vadd.f32 %v341_v19, %v336_v23  ;;  %v356_v45 = vmul.f32 %v355_v63, %v1499_v0  ;;  %s1829_s28 = sld [smem:[#allocation2 + $0x482]] }
  0x34   :  { %2526 = vst [vmem:[#allocation13_spill] sm:$0xff] %v1681_v34  ;;  %v357_v46 = vmul.f32 %v355_v63, %v1501_v1  ;;  %v358_v47 = vmul.f32 %v355_v63, %v1503_v2  ;;  %v359_v48 = vmul.f32 %v355_v63, %v1507_v6  ;;  %v360_v49 = vstv %s1626_s7  ;;  %s1844_s29 = sld [smem:[#allocation2 + $0x483]] }
  0x35   :  { %2527 = vst [vmem:[#allocation14_spill] sm:$0xff] %v1685_v35  ;;  %v369_v50 = vstv %s1641_s9  ;;  %v1716_v51 = vstv %s1620_s6  ;;  %v1719_v52 = vstv %s1632_s8  ;;  %v361_v53 = vmul.f32 %v360_v49, %v1509_v7  ;;  %s1850_s30 = sld [smem:[#allocation2 + $0x500]] }
  0x36   :  { %2528 = vst [vmem:[#allocation15_spill] sm:$0xff] %v1691_v37  ;;  %v362_v54 = vmul.f32 %v360_v49, %v1511_v8  ;;  %v363_v55 = vmul.f32 %v360_v49, %v1515_v10  ;;  %v364_v18 = vmul.f32 %v360_v49, %v1517_v11  ;;  %v222_v16 = vstv %s1330_s10  ;;  %s1852_s3 = sld [smem:[#allocation2 + $0x501]] }
  0x37   :  { %2529 = vst [vmem:[#allocation16_spill] sm:$0xff] %v1695_v38  ;;  %v370_v63 = vmul.f32 %v369_v50, %v1535_v26  ;;  %v371_v17 = vmul.f32 %v369_v50, %v1541_v29  ;;  %v372_v19 = vmul.f32 %v369_v50, %v1543_v30  ;;  %v223_v20 = vadd.f32 %v222_v16, %v1569_v56  ;;  %s1858_s4 = sld [smem:[#allocation2 + $0x502]] }
  0x38   :  { %2530 = vst [vmem:[#allocation17_spill] sm:$0xff] %v1699_v39  ;;  %v224_v21 = vadd.f32 %v222_v16, %v1576_v60  ;;  %v225_v22 = vadd.f32 %v222_v16, %v1578_v61  ;;  %v226_v23 = vadd.f32 %v222_v16, %v1580_v62  ;;  %v282_v39 = vstv %s1332_s12  ;;  %s1872_s5 = sld [smem:[#allocation2 + $0x503]] }
  0x39   :  { %2531 = vst [vmem:[#allocation18_spill] sm:$0xff] %v1703_v40  ;;  %v250_v40 = vstv %s1687_s11  ;;  %v365_v38 = vadd.f32 %v361_v53, %v356_v45  ;;  %v366_v49 = vadd.f32 %v362_v54, %v357_v46  ;;  %v283_v60 = vadd.f32 %v282_v39, %v1611_v36  ;;  %s1881_s6 = sld [smem:[#allocation2 + $0x580]] }
  0x3a   :  { %v251_v37 = vadd.f32 %v250_v40, %v1585_v3  ;;  %v252_v35 = vadd.f32 %v250_v40, %v1587_v4  ;;  %v253_v28 = vadd.f32 %v250_v40, %v1591_v12  ;;  %v254_v56 = vadd.f32 %v250_v40, %v1593_v13  ;;  %s1883_s7 = sld [smem:[#allocation2 + $0x581]] }
  0x3b   :  { %v284_v61 = vadd.f32 %v282_v39, %v1634_v57  ;;  %v285_v62 = vadd.f32 %v282_v39, %v1636_v58  ;;  %v286_v16 = vadd.f32 %v282_v39, %v1638_v59  ;;  %v314_v54 = vstv %s1705_s13  ;;  %s1889_s8 = sld [smem:[#allocation2 + $0x582]] }
  0x3c   :  { %v255_v45 = vmin.f32 %v223_v20, %v251_v37  ;;  %v256_v46 = vmin.f32 %v224_v21, %v252_v35  ;;  %v257_v53 = vmin.f32 %v225_v22, %v253_v28  ;;  %v258_v3 = vmin.f32 %v226_v23, %v254_v56  ;;  %s1904_s9 = sld [smem:[#allocation2 + $0x583]] }
  0x3d   :  { %v346_v4 = vstv %s1711_s14  ;;  %v367_v34 = vadd.f32 %v363_v55, %v358_v47  ;;  %v368_v12 = vadd.f32 %v364_v18, %v359_v48  ;;  %v315_v57 = vadd.f32 %v314_v54, %v1643_v5  ;;  %s1910_s10 = sld [smem:[#allocation2 + $0x600]] }
  0x3e   :  { %v287_v27 = vmin.f32 %v255_v45, %v283_v60  ;;  %v288_v13 = vmin.f32 %v256_v46, %v284_v61  ;;  %v289_v40 = vmin.f32 %v257_v53, %v285_v62  ;;  %v290_v36 = vmin.f32 %v258_v3, %v286_v16  ;;  %s1912_s11 = sld [smem:[#allocation2 + $0x601]] }
  0x3f   :  { %v316_v58 = vadd.f32 %v314_v54, %v1645_v9  ;;  %v317_v59 = vadd.f32 %v314_v54, %v1647_v14  ;;  %v318_v39 = vadd.f32 %v314_v54, %v1649_v15  ;;  %v347_v28 = vadd.f32 %v346_v4, %v342_v41  ;;  %s1918_s12 = sld [smem:[#allocation2 + $0x602]] }
  0x40   :  { %v348_v35 = vadd.f32 %v346_v4, %v343_v42  ;;  %v349_v37 = vadd.f32 %v346_v4, %v344_v43  ;;  %v350_v20 = vadd.f32 %v346_v4, %v345_v44  ;;  %v319_v47 = vmin.f32 %v287_v27, %v315_v57  ;;  %s1932_s13 = sld [smem:[#allocation2 + $0x603]] }
  0x41   :  { %v320_v48 = vmin.f32 %v288_v13, %v316_v58  ;;  %v321_v55 = vmin.f32 %v289_v40, %v317_v59  ;;  %v322_v18 = vmin.f32 %v290_v36, %v318_v39  ;;  %v373_v5 = vmul.f32 %v369_v50, %v1545_v31  ;;  %s1941_s14 = sld [smem:[#allocation2 + $0x680]] }
  0x42   :  { %v374_v9 = vadd.f32 %v370_v63, %v365_v38  ;;  %v375_v21 = vadd.f32 %v371_v17, %v366_v49  ;;  %v376_v14 = vadd.f32 %v372_v19, %v367_v34  ;;  %v351_v15 = vmin.f32 %v319_v47, %v347_v28 }
  0x43   :  { %v352_v22 = vmin.f32 %v320_v48, %v348_v35  ;;  %v1756_v41 = vmin.f32 %v321_v55, %v349_v37  ;;  %v1758_v42 = vmin.f32 %v322_v18, %v350_v20  ;;  %v377_v43 = vadd.f32 %v373_v5, %v368_v12 }
  0x44   :  { %v378_v27 = vstv %s1741_s15  ;;  %v388_v44 = vmul.f32 %v1716_v51, %v1499_v0  ;;  %v389_v38 = vmul.f32 %v1716_v51, %v1501_v1  ;;  %v390_v17 = vmul.f32 %v1716_v51, %v1503_v2  ;;  %s1943_s15 = sld [smem:[#allocation2 + $0x681]] }
  0x45   :  { %v379_v34 = vadd.f32 %v378_v27, %v374_v9  ;;  %v380_v50 = vadd.f32 %v378_v27, %v375_v21  ;;  %v381_v63 = vadd.f32 %v378_v27, %v376_v14  ;;  %v382_v19 = vadd.f32 %v378_v27, %v377_v43 }
  0x46   :  { %v391_v23 = vmul.f32 %v1716_v51, %v1507_v6  ;;  %v393_v49 = vmul.f32 %v1719_v52, %v1509_v7  ;;  %v394_v56 = vmul.f32 %v1719_v52, %v1511_v8  ;;  %v1779_v60 = vadd.f32 %v1673_v32, %v1657_v24 }
  0x47   :  { %v383_v61 = vmin.f32 %v351_v15, %v379_v34  ;;  %v384_v62 = vmin.f32 %v352_v22, %v380_v50  ;;  %v395_v16 = vmul.f32 %v1719_v52, %v1515_v10  ;;  %v385_v51 = vmin.f32 %v1756_v41, %v381_v63 }
  0x48   :  { %v396_v45 = vmul.f32 %v1719_v52, %v1517_v11  ;;  %v397_v46 = vadd.f32 %v393_v49, %v388_v44  ;;  %v398_v53 = vadd.f32 %v394_v56, %v389_v38  ;;  %v386_v24 = vmin.f32 %v1758_v42, %v382_v19 }
  0x49   :  { %v399_v32 = vadd.f32 %v395_v16, %v390_v17  ;;  %v401_v3 = vstv %s1751_s19  ;;  %v419_v54 = vstv %s1749_s18  ;;  %v410_v36 = vstv %s1754_s0  ;;  %s1949_s18 = sld [smem:[#allocation2 + $0x682]] }
  0x4a   :  { %v400_v4 = vadd.f32 %v396_v45, %v391_v23  ;;  %v402_v12 = vmul.f32 %v401_v3, %v1535_v26  ;;  %v403_v13 = vmul.f32 %v401_v3, %v1541_v29  ;;  %v404_v52 = vmul.f32 %v401_v3, %v1543_v30  ;;  %s1964_s19 = sld [smem:[#allocation2 + $0x683]] }
  0x4b   :  { %v405_v40 = vmul.f32 %v401_v3, %v1545_v31  ;;  %v420_v57 = vmul.f32 %v419_v54, %v1499_v0  ;;  %v421_v58 = vmul.f32 %v419_v54, %v1501_v1  ;;  %v422_v35 = vmul.f32 %v419_v54, %v1503_v2  ;;  %s1970_s0 = sld [smem:[#allocation2 + $0x700]] }
  0x4c   :  { %v406_v59 = vadd.f32 %v402_v12, %v397_v46  ;;  %v407_v39 = vadd.f32 %v403_v13, %v398_v53  ;;  %v408_v28 = vadd.f32 %v404_v52, %v399_v32  ;;  %v423_v20 = vmul.f32 %v419_v54, %v1507_v6 }
  0x4d   :  { %v409_v37 = vadd.f32 %v405_v40, %v400_v4  ;;  %v424_v47 = vstv %s1760_s1  ;;  %v433_v48 = vstv %s1767_s20  ;;  %v442_v27 = vstv %s1783_s21  ;;  %s1972_s1 = sld [smem:[#allocation2 + $0x701]] }
  0x4e   :  { %v411_v55 = vadd.f32 %v410_v36, %v406_v59  ;;  %v412_v18 = vadd.f32 %v410_v36, %v407_v39  ;;  %v413_v5 = vadd.f32 %v410_v36, %v408_v28  ;;  %v425_v9 = vmul.f32 %v424_v47, %v1509_v7  ;;  %s1978_s20 = sld [smem:[#allocation2 + $0x702]] }
  0x4f   :  { %v414_v21 = vadd.f32 %v410_v36, %v409_v37  ;;  %v426_v14 = vmul.f32 %v424_v47, %v1511_v8  ;;  %v427_v15 = vmul.f32 %v424_v47, %v1515_v10  ;;  %v428_v22 = vmul.f32 %v424_v47, %v1517_v11  ;;  %s1992_s21 = sld [smem:[#allocation2 + $0x703]] }
  0x50   :  { %v1814_v41 = vmin.f32 %v383_v61, %v411_v55  ;;  %v1816_v42 = vmin.f32 %v384_v62, %v412_v18  ;;  %v429_v43 = vadd.f32 %v425_v9, %v420_v57  ;;  %v1821_v44 = vmin.f32 %v385_v51, %v413_v5 }
  0x51   :  { %v430_v38 = vadd.f32 %v426_v14, %v421_v58  ;;  %v431_v34 = vadd.f32 %v427_v15, %v422_v35  ;;  %v432_v50 = vadd.f32 %v428_v22, %v423_v20  ;;  %v434_v63 = vmul.f32 %v433_v48, %v1535_v26 }
  0x52   :  { %v435_v17 = vmul.f32 %v433_v48, %v1541_v29  ;;  %v436_v19 = vmul.f32 %v433_v48, %v1543_v30  ;;  %v437_v23 = vmul.f32 %v433_v48, %v1545_v31  ;;  %v1831_v49 = vmin.f32 %v386_v24, %v414_v21 }
  0x53   :  { %v451_v56 = vstv %s1788_s22  ;;  %v456_v61 = vstv %s1793_s23  ;;  %v465_v62 = vstv %s1798_s24  ;;  %v438_v16 = vadd.f32 %v434_v63, %v429_v43  ;;  %s2001_s22 = sld [smem:[#allocation2 + $0x780]] }
  0x54   :  { %v439_v51 = vadd.f32 %v435_v17, %v430_v38  ;;  %v440_v45 = vadd.f32 %v436_v19, %v431_v34  ;;  %v441_v46 = vadd.f32 %v437_v23, %v432_v50  ;;  %v452_v53 = vmul.f32 %v451_v56, %v1499_v0  ;;  %s2003_s23 = sld [smem:[#allocation2 + $0x781]] }
  0x55   :  { %v453_v32 = vmul.f32 %v451_v56, %v1501_v1  ;;  %v454_v3 = vmul.f32 %v451_v56, %v1503_v2  ;;  %v455_v54 = vmul.f32 %v451_v56, %v1507_v6  ;;  %v443_v4 = vadd.f32 %v442_v27, %v438_v16  ;;  %s2009_s24 = sld [smem:[#allocation2 + $0x782]] }
  0x56   :  { %v444_v12 = vadd.f32 %v442_v27, %v439_v51  ;;  %v445_v24 = vadd.f32 %v442_v27, %v440_v45  ;;  %v446_v13 = vadd.f32 %v442_v27, %v441_v46  ;;  %v457_v52 = vmul.f32 %v456_v61, %v1509_v7 }
  0x57   :  { %v458_v40 = vmul.f32 %v456_v61, %v1511_v8  ;;  %v459_v36 = vmul.f32 %v456_v61, %v1515_v10  ;;  %v460_v57 = vmul.f32 %v456_v61, %v1517_v11  ;;  %v447_v58 = vmin.f32 %v1814_v41, %v443_v4 }
  0x58   :  { %v448_v59 = vmin.f32 %v1816_v42, %v444_v12  ;;  %v449_v39 = vmin.f32 %v1821_v44, %v445_v24  ;;  %v474_v28 = vstv %s1812_s25  ;;  %v461_v35 = vadd.f32 %v457_v52, %v452_v53  ;;  %s2042_s25 = sld [smem:[#allocation2 + $0x783]] }
  0x59   :  { %v462_v37 = vadd.f32 %v458_v40, %v453_v32  ;;  %v463_v20 = vadd.f32 %v459_v36, %v454_v3  ;;  %v464_v47 = vadd.f32 %v460_v57, %v455_v54  ;;  %v466_v48 = vmul.f32 %v465_v62, %v1535_v26 }
  0x5a   :  { %v467_v55 = vmul.f32 %v465_v62, %v1541_v29  ;;  %v468_v18 = vmul.f32 %v465_v62, %v1543_v30  ;;  %v469_v5 = vmul.f32 %v465_v62, %v1545_v31  ;;  %v450_v9 = vmin.f32 %v1831_v49, %v446_v13 }
  0x5b   :  { %v483_v21 = vstv %s1819_s26  ;;  %v488_v14 = vstv %s1823_s27  ;;  %v497_v15 = vstv %s1829_s28  ;;  %v470_v22 = vadd.f32 %v466_v48, %v461_v35  ;;  %s2048_s26 = sld [smem:[#allocation2 + $0x800]] }
  0x5c   :  { %v471_v41 = vadd.f32 %v467_v55, %v462_v37  ;;  %v472_v42 = vadd.f32 %v468_v18, %v463_v20  ;;  %v473_v43 = vadd.f32 %v469_v5, %v464_v47  ;;  %v484_v27 = vmul.f32 %v483_v21, %v1499_v0  ;;  %s2050_s27 = sld [smem:[#allocation2 + $0x801]] }
  0x5d   :  { %v485_v44 = vmul.f32 %v483_v21, %v1501_v1  ;;  %v486_v38 = vmul.f32 %v483_v21, %v1503_v2  ;;  %v487_v34 = vmul.f32 %v483_v21, %v1507_v6  ;;  %v475_v50 = vadd.f32 %v474_v28, %v470_v22  ;;  %s2064_s28 = sld [smem:[#allocation2 + $0x802]] }
  0x5e   :  { %v476_v63 = vadd.f32 %v474_v28, %v471_v41  ;;  %v477_v17 = vadd.f32 %v474_v28, %v472_v42  ;;  %v478_v19 = vadd.f32 %v474_v28, %v473_v43  ;;  %v489_v23 = vmul.f32 %v488_v14, %v1509_v7 }
  0x5f   :  { %v490_v49 = vmul.f32 %v488_v14, %v1511_v8  ;;  %v491_v56 = vmul.f32 %v488_v14, %v1515_v10  ;;  %v492_v61 = vmul.f32 %v488_v14, %v1517_v11  ;;  %v1874_v62 = vmin.f32 %v447_v58, %v475_v50 }
  0x60   :  { %v1876_v16 = vmin.f32 %v448_v59, %v476_v63  ;;  %v1878_v51 = vmin.f32 %v449_v39, %v477_v17  ;;  %v506_v45 = vstv %s1844_s29  ;;  %v493_v46 = vadd.f32 %v489_v23, %v484_v27  ;;  %s2079_s29 = sld [smem:[#allocation2 + $0x803]] }
  0x61   :  { %v494_v53 = vadd.f32 %v490_v49, %v485_v44  ;;  %v495_v32 = vadd.f32 %v491_v56, %v486_v38  ;;  %v496_v3 = vadd.f32 %v492_v61, %v487_v34  ;;  %v498_v54 = vmul.f32 %v497_v15, %v1535_v26 }
  0x62   :  { %v499_v4 = vmul.f32 %v497_v15, %v1541_v29  ;;  %v500_v12 = vmul.f32 %v497_v15, %v1543_v30  ;;  %v501_v24 = vmul.f32 %v497_v15, %v1545_v31  ;;  %v1891_v13 = vmin.f32 %v450_v9, %v478_v19 }
  0x63   :  { %v515_v52 = vstv %s1850_s30  ;;  %v520_v40 = vstv %s1852_s3  ;;  %v529_v36 = vstv %s1858_s4  ;;  %v502_v57 = vadd.f32 %v498_v54, %v493_v46  ;;  %s2088_s30 = sld [smem:[#allocation2 + $0x880]] }
  0x64   :  { %v503_v58 = vadd.f32 %v499_v4, %v494_v53  ;;  %v504_v59 = vadd.f32 %v500_v12, %v495_v32  ;;  %v505_v39 = vadd.f32 %v501_v24, %v496_v3  ;;  %v516_v28 = vmul.f32 %v515_v52, %v1499_v0  ;;  %s2090_s3 = sld [smem:[#allocation2 + $0x881]] }
  0x65   :  { %v517_v35 = vmul.f32 %v515_v52, %v1501_v1  ;;  %v518_v37 = vmul.f32 %v515_v52, %v1503_v2  ;;  %v519_v20 = vmul.f32 %v515_v52, %v1507_v6  ;;  %v507_v47 = vadd.f32 %v506_v45, %v502_v57  ;;  %s2096_s4 = sld [smem:[#allocation2 + $0x882]] }
  0x66   :  { %v508_v48 = vadd.f32 %v506_v45, %v503_v58  ;;  %v509_v55 = vadd.f32 %v506_v45, %v504_v59  ;;  %v510_v18 = vadd.f32 %v506_v45, %v505_v39  ;;  %v521_v5 = vmul.f32 %v520_v40, %v1509_v7 }
  0x67   :  { %v522_v9 = vmul.f32 %v520_v40, %v1511_v8  ;;  %v523_v21 = vmul.f32 %v520_v40, %v1515_v10  ;;  %v524_v14 = vmul.f32 %v520_v40, %v1517_v11  ;;  %v511_v15 = vmin.f32 %v1874_v62, %v507_v47 }
  0x68   :  { %v512_v22 = vmin.f32 %v1876_v16, %v508_v48  ;;  %v513_v41 = vmin.f32 %v1878_v51, %v509_v55  ;;  %v538_v42 = vstv %s1872_s5  ;;  %v525_v43 = vadd.f32 %v521_v5, %v516_v28  ;;  %s2111_s5 = sld [smem:[#allocation2 + $0x883]] }
  0x69   :  { %v526_v27 = vadd.f32 %v522_v9, %v517_v35  ;;  %v527_v44 = vadd.f32 %v523_v21, %v518_v37  ;;  %v528_v38 = vadd.f32 %v524_v14, %v519_v20  ;;  %v530_v34 = vmul.f32 %v529_v36, %v1535_v26 }
  0x6a   :  { %v531_v50 = vmul.f32 %v529_v36, %v1541_v29  ;;  %v532_v63 = vmul.f32 %v529_v36, %v1543_v30  ;;  %v533_v17 = vmul.f32 %v529_v36, %v1545_v31  ;;  %v514_v19 = vmin.f32 %v1891_v13, %v510_v18 }
  0x6b   :  { %v547_v23 = vstv %s1881_s6  ;;  %v552_v49 = vstv %s1883_s7  ;;  %v561_v56 = vstv %s1889_s8  ;;  %v534_v61 = vadd.f32 %v530_v34, %v525_v43  ;;  %s2117_s6 = sld [smem:[#allocation2 + $0x900]] }
  0x6c   :  { %v535_v62 = vadd.f32 %v531_v50, %v526_v27  ;;  %v536_v16 = vadd.f32 %v532_v63, %v527_v44  ;;  %v537_v51 = vadd.f32 %v533_v17, %v528_v38  ;;  %v548_v45 = vmul.f32 %v547_v23, %v1499_v0  ;;  %s2119_s7 = sld [smem:[#allocation2 + $0x901]] }
  0x6d   :  { %v549_v46 = vmul.f32 %v547_v23, %v1501_v1  ;;  %v550_v53 = vmul.f32 %v547_v23, %v1503_v2  ;;  %v551_v32 = vmul.f32 %v547_v23, %v1507_v6  ;;  %v539_v3 = vadd.f32 %v538_v42, %v534_v61  ;;  %s2125_s8 = sld [smem:[#allocation2 + $0x902]] }
  0x6e   :  { %v540_v54 = vadd.f32 %v538_v42, %v535_v62  ;;  %v541_v4 = vadd.f32 %v538_v42, %v536_v16  ;;  %v542_v12 = vadd.f32 %v538_v42, %v537_v51  ;;  %v553_v24 = vmul.f32 %v552_v49, %v1509_v7 }
  0x6f   :  { %v554_v13 = vmul.f32 %v552_v49, %v1511_v8  ;;  %v555_v52 = vmul.f32 %v552_v49, %v1515_v10  ;;  %v556_v40 = vmul.f32 %v552_v49, %v1517_v11  ;;  %v1934_v36 = vmin.f32 %v511_v15, %v539_v3 }
  0x70   :  { %v1936_v57 = vmin.f32 %v512_v22, %v540_v54  ;;  %v1938_v58 = vmin.f32 %v513_v41, %v541_v4  ;;  %v570_v59 = vstv %s1904_s9  ;;  %v557_v39 = vadd.f32 %v553_v24, %v548_v45  ;;  %s2139_s9 = sld [smem:[#allocation2 + $0x903]] }
  0x71   :  { %v558_v28 = vadd.f32 %v554_v13, %v549_v46  ;;  %v559_v35 = vadd.f32 %v555_v52, %v550_v53  ;;  %v560_v37 = vadd.f32 %v556_v40, %v551_v32  ;;  %v562_v20 = vmul.f32 %v561_v56, %v1535_v26 }
  0x72   :  { %v563_v47 = vmul.f32 %v561_v56, %v1541_v29  ;;  %v564_v48 = vmul.f32 %v561_v56, %v1543_v30  ;;  %v565_v55 = vmul.f32 %v561_v56, %v1545_v31  ;;  %v1951_v18 = vmin.f32 %v514_v19, %v542_v12 }
  0x73   :  { %v579_v5 = vstv %s1910_s10  ;;  %v584_v9 = vstv %s1912_s11  ;;  %v593_v21 = vstv %s1918_s12  ;;  %v566_v14 = vadd.f32 %v562_v20, %v557_v39  ;;  %s2148_s10 = sld [smem:[#allocation2 + $0x980]] }
  0x74   :  { %v567_v15 = vadd.f32 %v563_v47, %v558_v28  ;;  %v568_v22 = vadd.f32 %v564_v48, %v559_v35  ;;  %v569_v41 = vadd.f32 %v565_v55, %v560_v37  ;;  %v580_v42 = vmul.f32 %v579_v5, %v1499_v0  ;;  %s2150_s11 = sld [smem:[#allocation2 + $0x981]] }
  0x75   :  { %v581_v43 = vmul.f32 %v579_v5, %v1501_v1  ;;  %v582_v27 = vmul.f32 %v579_v5, %v1503_v2  ;;  %v583_v44 = vmul.f32 %v579_v5, %v1507_v6  ;;  %v571_v38 = vadd.f32 %v570_v59, %v566_v14  ;;  %s2156_s12 = sld [smem:[#allocation2 + $0x982]] }
  0x76   :  { %v572_v34 = vadd.f32 %v570_v59, %v567_v15  ;;  %v573_v50 = vadd.f32 %v570_v59, %v568_v22  ;;  %v574_v63 = vadd.f32 %v570_v59, %v569_v41  ;;  %v585_v17 = vmul.f32 %v584_v9, %v1509_v7 }
  0x77   :  { %v586_v19 = vmul.f32 %v584_v9, %v1511_v8  ;;  %v587_v23 = vmul.f32 %v584_v9, %v1515_v10  ;;  %v588_v49 = vmul.f32 %v584_v9, %v1517_v11  ;;  %v575_v56 = vmin.f32 %v1934_v36, %v571_v38 }
  0x78   :  { %v576_v61 = vmin.f32 %v1936_v57, %v572_v34  ;;  %v577_v62 = vmin.f32 %v1938_v58, %v573_v50  ;;  %v602_v16 = vstv %s1932_s13  ;;  %v589_v51 = vadd.f32 %v585_v17, %v580_v42  ;;  %s2171_s13 = sld [smem:[#allocation2 + $0x983]] }
  0x79   :  { %v590_v45 = vadd.f32 %v586_v19, %v581_v43  ;;  %v591_v46 = vadd.f32 %v587_v23, %v582_v27  ;;  %v592_v53 = vadd.f32 %v588_v49, %v583_v44  ;;  %v594_v32 = vmul.f32 %v593_v21, %v1535_v26  ;;  %v2025_v19 = vld [vmem:[#allocation6 + $0x18] sm:$0xff] }
  0x7a   :  { %v595_v3 = vmul.f32 %v593_v21, %v1541_v29  ;;  %v596_v54 = vmul.f32 %v593_v21, %v1543_v30  ;;  %v597_v4 = vmul.f32 %v593_v21, %v1545_v31  ;;  %v578_v12 = vmin.f32 %v1951_v18, %v574_v63  ;;  %v2016_v63 = vld [vmem:[#allocation6] sm:$0xff] }
  0x7b   :  { %v611_v24 = vstv %s1941_s14  ;;  %v616_v13 = vstv %s1943_s15  ;;  %v625_v52 = vstv %s1949_s18  ;;  %v598_v40 = vadd.f32 %v594_v32, %v589_v51  ;;  %s2177_s14 = sld [smem:[#allocation2 + $0xa00]] }
  0x7c   :  { %v599_v36 = vadd.f32 %v595_v3, %v590_v45  ;;  %v600_v57 = vadd.f32 %v596_v54, %v591_v46  ;;  %v601_v58 = vadd.f32 %v597_v4, %v592_v53  ;;  %v612_v59 = vmul.f32 %v611_v24, %v1499_v0  ;;  %v2033_v45 = vld [vmem:[#allocation6 + $0x28] sm:$0xff]  ;;  %v2036_v53 = vld [vmem:[#allocation6 + $0x30] sm:$0xff]  ;;  %v2039_v3 = vld [vmem:[#allocation6 + $0x38] sm:$0xff]  ;;  %s2179_s15 = sld [smem:[#allocation2 + $0xa01]] }
  0x7d   :  { %v613_v39 = vmul.f32 %v611_v24, %v1501_v1  ;;  %v614_v28 = vmul.f32 %v611_v24, %v1503_v2  ;;  %v615_v35 = vmul.f32 %v611_v24, %v1507_v6  ;;  %v603_v37 = vadd.f32 %v602_v16, %v598_v40  ;;  %s2185_s18 = sld [smem:[#allocation2 + $0xa02]] }
  0x7e   :  { %v604_v20 = vadd.f32 %v602_v16, %v599_v36  ;;  %v605_v47 = vadd.f32 %v602_v16, %v600_v57  ;;  %v606_v48 = vadd.f32 %v602_v16, %v601_v58  ;;  %v617_v55 = vmul.f32 %v616_v13, %v1509_v7  ;;  %v2030_v16 = vld [vmem:[#allocation6 + $0x20] sm:$0xff] }
  0x7f   :  { %v618_v18 = vmul.f32 %v616_v13, %v1511_v8  ;;  %v619_v5 = vmul.f32 %v616_v13, %v1515_v10  ;;  %v620_v9 = vmul.f32 %v616_v13, %v1517_v11  ;;  %v1994_v0 = vmin.f32 %v575_v56, %v603_v37  ;;  %v2052_v58 = vld [vmem:[#allocation6 + $0x40] sm:$0xff] }
  0x80   :  { %v1996_v1 = vmin.f32 %v576_v61, %v604_v20  ;;  %v1998_v2 = vmin.f32 %v577_v62, %v605_v47  ;;  %v634_v6 = vstv %s1964_s19  ;;  %v621_v7 = vadd.f32 %v617_v55, %v612_v59  ;;  %v2061_v20 = vld [vmem:[#allocation6 + $0x58] sm:$0xff]  ;;  %s2199_s19 = sld [smem:[#allocation2 + $0xa03]] }
  0x81   :  { %v622_v8 = vadd.f32 %v618_v18, %v613_v39  ;;  %v623_v21 = vadd.f32 %v619_v5, %v614_v28  ;;  %v624_v10 = vadd.f32 %v620_v9, %v615_v35  ;;  %v626_v11 = vmul.f32 %v625_v52, %v1535_v26  ;;  %v2055_v39 = vld [vmem:[#allocation6 + $0x48] sm:$0xff]  ;;  %v2058_v35 = vld [vmem:[#allocation6 + $0x50] sm:$0xff] }
  0x82   :  { %v627_v14 = vmul.f32 %v625_v52, %v1541_v29  ;;  %v628_v15 = vmul.f32 %v625_v52, %v1543_v30  ;;  %v629_v22 = vmul.f32 %v625_v52, %v1545_v31  ;;  %v2011_v41 = vmin.f32 %v578_v12, %v606_v48  ;;  %v2019_v29 = vld [vmem:[#allocation6 + $0x8] sm:$0xff]  ;;  %v2022_v31 = vld [vmem:[#allocation6 + $0x10] sm:$0xff] }
  0x83   :  { %v643_v42 = vstv %s1970_s0  ;;  %v648_v43 = vstv %s1972_s1  ;;  %v657_v27 = vstv %s1978_s20  ;;  %v630_v44 = vadd.f32 %v626_v11, %v621_v7  ;;  %s2208_s0 = sld [smem:[#allocation2 + $0xa80]] }
  0x84   :  { %v631_v38 = vadd.f32 %v627_v14, %v622_v8  ;;  %v632_v34 = vadd.f32 %v628_v15, %v623_v21  ;;  %v633_v50 = vadd.f32 %v629_v22, %v624_v10  ;;  %v644_v26 = vmul.f32 %v2016_v63, %v643_v42  ;;  %s2210_s1 = sld [smem:[#allocation2 + $0xa81]] }
  0x85   :  { %v645_v30 = vmul.f32 %v2019_v29, %v643_v42  ;;  %v646_v17 = vmul.f32 %v2022_v31, %v643_v42  ;;  %v647_v23 = vmul.f32 %v2025_v19, %v643_v42  ;;  %v635_v49 = vadd.f32 %v634_v6, %v630_v44  ;;  %s2216_s20 = sld [smem:[#allocation2 + $0xa82]] }
  0x86   :  { %v636_v56 = vadd.f32 %v634_v6, %v631_v38  ;;  %v637_v61 = vadd.f32 %v634_v6, %v632_v34  ;;  %v2028_v62 = vadd.f32 %v634_v6, %v633_v50  ;;  %v649_v51 = vmul.f32 %v2030_v16, %v648_v43 }
  0x87   :  { %v650_v46 = vmul.f32 %v2033_v45, %v648_v43  ;;  %v651_v32 = vmul.f32 %v2036_v53, %v648_v43  ;;  %v652_v54 = vmul.f32 %v2039_v3, %v648_v43  ;;  %v639_v4 = vmin.f32 %v1994_v0, %v635_v49 }
  0x88   :  { %v640_v12 = vmin.f32 %v1996_v1, %v636_v56  ;;  %v641_v24 = vmin.f32 %v1998_v2, %v637_v61  ;;  %v666_v13 = vstv %s1992_s21  ;;  %v653_v52 = vadd.f32 %v649_v51, %v644_v26  ;;  %s2231_s21 = sld [smem:[#allocation2 + $0xa83]] }
  0x89   :  { %v654_v40 = vadd.f32 %v650_v46, %v645_v30  ;;  %v655_v36 = vadd.f32 %v651_v32, %v646_v17  ;;  %v656_v57 = vadd.f32 %v652_v54, %v647_v23  ;;  %v658_v59 = vmul.f32 %v2052_v58, %v657_v27 }
  0x8a   :  { %v659_v28 = vmul.f32 %v2055_v39, %v657_v27  ;;  %v660_v37 = vmul.f32 %v2058_v35, %v657_v27  ;;  %v661_v47 = vmul.f32 %v2061_v20, %v657_v27  ;;  %v642_v48 = vmin.f32 %v2011_v41, %v2028_v62 }
  0x8b   :  { %v675_v55 = vstv %s2001_s22  ;;  %v680_v18 = vstv %s2003_s23  ;;  %v689_v5 = vstv %s2009_s24  ;;  %v662_v9 = vadd.f32 %v658_v59, %v653_v52  ;;  %s2237_s22 = sld [smem:[#allocation2 + $0xb00]] }
  0x8c   :  { %v663_v0 = vadd.f32 %v659_v28, %v654_v40  ;;  %v664_v1 = vadd.f32 %v660_v37, %v655_v36  ;;  %v665_v2 = vadd.f32 %v661_v47, %v656_v57  ;;  %v676_v6 = vmul.f32 %v2016_v63, %v675_v55  ;;  %s2239_s23 = sld [smem:[#allocation2 + $0xb01]] }
  0x8d   :  { %v677_v7 = vmul.f32 %v2019_v29, %v675_v55  ;;  %v678_v8 = vmul.f32 %v2022_v31, %v675_v55  ;;  %v679_v21 = vmul.f32 %v2025_v19, %v675_v55  ;;  %v667_v10 = vadd.f32 %v666_v13, %v662_v9  ;;  %s2245_s24 = sld [smem:[#allocation2 + $0xb02]] }
  0x8e   :  { %v668_v11 = vadd.f32 %v666_v13, %v663_v0  ;;  %v669_v14 = vadd.f32 %v666_v13, %v664_v1  ;;  %v670_v15 = vadd.f32 %v666_v13, %v665_v2  ;;  %v681_v22 = vmul.f32 %v2030_v16, %v680_v18 }
  0x8f   :  { %v682_v41 = vmul.f32 %v2033_v45, %v680_v18  ;;  %v683_v42 = vmul.f32 %v2036_v53, %v680_v18  ;;  %v684_v43 = vmul.f32 %v2039_v3, %v680_v18  ;;  %v2081_v27 = vmin.f32 %v639_v4, %v667_v10 }
  0x90   :  { %v2083_v44 = vmin.f32 %v640_v12, %v668_v11  ;;  %v2085_v38 = vmin.f32 %v641_v24, %v669_v14  ;;  %v698_v34 = vstv %s2042_s25  ;;  %v685_v50 = vadd.f32 %v681_v22, %v676_v6  ;;  %s2259_s25 = sld [smem:[#allocation2 + $0xb03]] }
  0x91   :  { %v686_v26 = vadd.f32 %v682_v41, %v677_v7  ;;  %v687_v30 = vadd.f32 %v683_v42, %v678_v8  ;;  %v688_v17 = vadd.f32 %v684_v43, %v679_v21  ;;  %v690_v23 = vmul.f32 %v2052_v58, %v689_v5 }
  0x92   :  { %v691_v49 = vmul.f32 %v2055_v39, %v689_v5  ;;  %v692_v56 = vmul.f32 %v2058_v35, %v689_v5  ;;  %v693_v61 = vmul.f32 %v2061_v20, %v689_v5  ;;  %v2098_v62 = vmin.f32 %v642_v48, %v670_v15 }
  0x93   :  { %v707_v51 = vstv %s2048_s26  ;;  %v712_v46 = vstv %s2050_s27  ;;  %v721_v32 = vstv %s2064_s28  ;;  %v694_v54 = vadd.f32 %v690_v23, %v685_v50  ;;  %s2268_s26 = sld [smem:[#allocation2 + $0xb80]] }
  0x94   :  { %v695_v4 = vadd.f32 %v691_v49, %v686_v26  ;;  %v696_v12 = vadd.f32 %v692_v56, %v687_v30  ;;  %v697_v24 = vadd.f32 %v693_v61, %v688_v17  ;;  %v708_v13 = vmul.f32 %v2016_v63, %v707_v51  ;;  %s2270_s27 = sld [smem:[#allocation2 + $0xb81]] }
  0x95   :  { %v709_v52 = vmul.f32 %v2019_v29, %v707_v51  ;;  %v710_v40 = vmul.f32 %v2022_v31, %v707_v51  ;;  %v711_v36 = vmul.f32 %v2025_v19, %v707_v51  ;;  %v699_v57 = vadd.f32 %v698_v34, %v694_v54  ;;  %s2276_s28 = sld [smem:[#allocation2 + $0xb82]] }
  0x96   :  { %v700_v59 = vadd.f32 %v698_v34, %v695_v4  ;;  %v701_v28 = vadd.f32 %v698_v34, %v696_v12  ;;  %v702_v37 = vadd.f32 %v698_v34, %v697_v24  ;;  %v713_v47 = vmul.f32 %v2030_v16, %v712_v46 }
  0x97   :  { %v714_v48 = vmul.f32 %v2033_v45, %v712_v46  ;;  %v715_v55 = vmul.f32 %v2036_v53, %v712_v46  ;;  %v716_v18 = vmul.f32 %v2039_v3, %v712_v46  ;;  %v703_v5 = vmin.f32 %v2081_v27, %v699_v57 }
  0x98   :  { %v704_v9 = vmin.f32 %v2083_v44, %v700_v59  ;;  %v705_v0 = vmin.f32 %v2085_v38, %v701_v28  ;;  %v730_v1 = vstv %s2079_s29  ;;  %v717_v2 = vadd.f32 %v713_v47, %v708_v13  ;;  %s2291_s29 = sld [smem:[#allocation2 + $0xb83]] }
  0x99   :  { %v718_v6 = vadd.f32 %v714_v48, %v709_v52  ;;  %v719_v7 = vadd.f32 %v715_v55, %v710_v40  ;;  %v720_v8 = vadd.f32 %v716_v18, %v711_v36  ;;  %v722_v21 = vmul.f32 %v2052_v58, %v721_v32 }
  0x9a   :  { %v723_v10 = vmul.f32 %v2055_v39, %v721_v32  ;;  %v724_v11 = vmul.f32 %v2058_v35, %v721_v32  ;;  %v725_v14 = vmul.f32 %v2061_v20, %v721_v32  ;;  %v706_v15 = vmin.f32 %v2098_v62, %v702_v37 }
  0x9b   :  { %v739_v22 = vstv %s2088_s30  ;;  %v744_v41 = vstv %s2090_s3  ;;  %v753_v42 = vstv %s2096_s4  ;;  %v726_v43 = vadd.f32 %v722_v21, %v717_v2  ;;  %s2297_s30 = sld [smem:[#allocation2 + $0xc00]] }
  0x9c   :  { %v727_v27 = vadd.f32 %v723_v10, %v718_v6  ;;  %v728_v44 = vadd.f32 %v724_v11, %v719_v7  ;;  %v729_v38 = vadd.f32 %v725_v14, %v720_v8  ;;  %v740_v34 = vmul.f32 %v2016_v63, %v739_v22  ;;  %s2299_s3 = sld [smem:[#allocation2 + $0xc01]] }
  0x9d   :  { %v741_v50 = vmul.f32 %v2019_v29, %v739_v22  ;;  %v742_v26 = vmul.f32 %v2022_v31, %v739_v22  ;;  %v743_v30 = vmul.f32 %v2025_v19, %v739_v22  ;;  %v731_v17 = vadd.f32 %v730_v1, %v726_v43  ;;  %s2305_s4 = sld [smem:[#allocation2 + $0xc02]] }
  0x9e   :  { %v732_v23 = vadd.f32 %v730_v1, %v727_v27  ;;  %v733_v49 = vadd.f32 %v730_v1, %v728_v44  ;;  %v734_v56 = vadd.f32 %v730_v1, %v729_v38  ;;  %v745_v61 = vmul.f32 %v2030_v16, %v744_v41 }
  0x9f   :  { %v746_v62 = vmul.f32 %v2033_v45, %v744_v41  ;;  %v747_v51 = vmul.f32 %v2036_v53, %v744_v41  ;;  %v748_v46 = vmul.f32 %v2039_v3, %v744_v41  ;;  %v2141_v32 = vmin.f32 %v703_v5, %v731_v17 }
  0xa0   :  { %v2143_v54 = vmin.f32 %v704_v9, %v732_v23  ;;  %v2145_v4 = vmin.f32 %v705_v0, %v733_v49  ;;  %v762_v12 = vstv %s2111_s5  ;;  %v749_v24 = vadd.f32 %v745_v61, %v740_v34  ;;  %s2319_s5 = sld [smem:[#allocation2 + $0xc03]] }
  0xa1   :  { %v750_v13 = vadd.f32 %v746_v62, %v741_v50  ;;  %v751_v52 = vadd.f32 %v747_v51, %v742_v26  ;;  %v752_v40 = vadd.f32 %v748_v46, %v743_v30  ;;  %v754_v36 = vmul.f32 %v2052_v58, %v753_v42 }
  0xa2   :  { %v755_v57 = vmul.f32 %v2055_v39, %v753_v42  ;;  %v756_v59 = vmul.f32 %v2058_v35, %v753_v42  ;;  %v757_v28 = vmul.f32 %v2061_v20, %v753_v42  ;;  %v2158_v37 = vmin.f32 %v706_v15, %v734_v56 }
  0xa3   :  { %v771_v47 = vstv %s2117_s6  ;;  %v776_v48 = vstv %s2119_s7  ;;  %v785_v55 = vstv %s2125_s8  ;;  %v758_v18 = vadd.f32 %v754_v36, %v749_v24  ;;  %s2328_s6 = sld [smem:[#allocation2 + $0xc80]] }
  0xa4   :  { %v759_v5 = vadd.f32 %v755_v57, %v750_v13  ;;  %v760_v9 = vadd.f32 %v756_v59, %v751_v52  ;;  %v761_v0 = vadd.f32 %v757_v28, %v752_v40  ;;  %v772_v1 = vmul.f32 %v2016_v63, %v771_v47  ;;  %s2330_s7 = sld [smem:[#allocation2 + $0xc81]] }
  0xa5   :  { %v773_v2 = vmul.f32 %v2019_v29, %v771_v47  ;;  %v774_v6 = vmul.f32 %v2022_v31, %v771_v47  ;;  %v775_v7 = vmul.f32 %v2025_v19, %v771_v47  ;;  %v763_v8 = vadd.f32 %v762_v12, %v758_v18  ;;  %s2336_s8 = sld [smem:[#allocation2 + $0xc82]] }
  0xa6   :  { %v764_v21 = vadd.f32 %v762_v12, %v759_v5  ;;  %v765_v10 = vadd.f32 %v762_v12, %v760_v9  ;;  %v766_v11 = vadd.f32 %v762_v12, %v761_v0  ;;  %v777_v14 = vmul.f32 %v2030_v16, %v776_v48 }
  0xa7   :  { %v778_v15 = vmul.f32 %v2033_v45, %v776_v48  ;;  %v779_v22 = vmul.f32 %v2036_v53, %v776_v48  ;;  %v780_v41 = vmul.f32 %v2039_v3, %v776_v48  ;;  %v767_v42 = vmin.f32 %v2141_v32, %v763_v8 }
  0xa8   :  { %v768_v43 = vmin.f32 %v2143_v54, %v764_v21  ;;  %v769_v27 = vmin.f32 %v2145_v4, %v765_v10  ;;  %v794_v44 = vstv %s2139_s9  ;;  %v781_v38 = vadd.f32 %v777_v14, %v772_v1  ;;  %s2351_s9 = sld [smem:[#allocation2 + $0xc83]] }
  0xa9   :  { %v782_v34 = vadd.f32 %v778_v15, %v773_v2  ;;  %v783_v50 = vadd.f32 %v779_v22, %v774_v6  ;;  %v784_v26 = vadd.f32 %v780_v41, %v775_v7  ;;  %v786_v30 = vmul.f32 %v2052_v58, %v785_v55 }
  0xaa   :  { %v787_v17 = vmul.f32 %v2055_v39, %v785_v55  ;;  %v788_v23 = vmul.f32 %v2058_v35, %v785_v55  ;;  %v789_v49 = vmul.f32 %v2061_v20, %v785_v55  ;;  %v770_v56 = vmin.f32 %v2158_v37, %v766_v11 }
  0xab   :  { %v803_v61 = vstv %s2148_s10  ;;  %v808_v62 = vstv %s2150_s11  ;;  %v817_v51 = vstv %s2156_s12  ;;  %v790_v46 = vadd.f32 %v786_v30, %v781_v38  ;;  %s2357_s10 = sld [smem:[#allocation2 + $0xd00]] }
  0xac   :  { %v791_v32 = vadd.f32 %v787_v17, %v782_v34  ;;  %v792_v54 = vadd.f32 %v788_v23, %v783_v50  ;;  %v793_v4 = vadd.f32 %v789_v49, %v784_v26  ;;  %v804_v12 = vmul.f32 %v2016_v63, %v803_v61  ;;  %s2359_s11 = sld [smem:[#allocation2 + $0xd01]] }
  0xad   :  { %v805_v24 = vmul.f32 %v2019_v29, %v803_v61  ;;  %v806_v13 = vmul.f32 %v2022_v31, %v803_v61  ;;  %v807_v52 = vmul.f32 %v2025_v19, %v803_v61  ;;  %v795_v40 = vadd.f32 %v794_v44, %v790_v46  ;;  %s2365_s12 = sld [smem:[#allocation2 + $0xd02]] }
  0xae   :  { %v796_v36 = vadd.f32 %v794_v44, %v791_v32  ;;  %v797_v57 = vadd.f32 %v794_v44, %v792_v54  ;;  %v798_v59 = vadd.f32 %v794_v44, %v793_v4  ;;  %v809_v28 = vmul.f32 %v2030_v16, %v808_v62 }
  0xaf   :  { %v810_v37 = vmul.f32 %v2033_v45, %v808_v62  ;;  %v811_v47 = vmul.f32 %v2036_v53, %v808_v62  ;;  %v812_v48 = vmul.f32 %v2039_v3, %v808_v62  ;;  %v2201_v55 = vmin.f32 %v767_v42, %v795_v40 }
  0xb0   :  { %v2203_v18 = vmin.f32 %v768_v43, %v796_v36  ;;  %v2205_v5 = vmin.f32 %v769_v27, %v797_v57  ;;  %v826_v9 = vstv %s2171_s13  ;;  %v813_v0 = vadd.f32 %v809_v28, %v804_v12  ;;  %s2379_s13 = sld [smem:[#allocation2 + $0xd03]] }
  0xb1   :  { %v814_v1 = vadd.f32 %v810_v37, %v805_v24  ;;  %v815_v2 = vadd.f32 %v811_v47, %v806_v13  ;;  %v816_v6 = vadd.f32 %v812_v48, %v807_v52  ;;  %v818_v7 = vmul.f32 %v2052_v58, %v817_v51 }
  0xb2   :  { %v819_v8 = vmul.f32 %v2055_v39, %v817_v51  ;;  %v820_v21 = vmul.f32 %v2058_v35, %v817_v51  ;;  %v821_v10 = vmul.f32 %v2061_v20, %v817_v51  ;;  %v2218_v11 = vmin.f32 %v770_v56, %v798_v59 }
  0xb3   :  { %v835_v14 = vstv %s2177_s14  ;;  %v840_v15 = vstv %s2179_s15  ;;  %v849_v22 = vstv %s2185_s18  ;;  %v822_v41 = vadd.f32 %v818_v7, %v813_v0  ;;  %s2388_s14 = sld [smem:[#allocation2 + $0xd80]] }
  0xb4   :  { %v823_v42 = vadd.f32 %v819_v8, %v814_v1  ;;  %v824_v43 = vadd.f32 %v820_v21, %v815_v2  ;;  %v825_v27 = vadd.f32 %v821_v10, %v816_v6  ;;  %v836_v44 = vmul.f32 %v2016_v63, %v835_v14  ;;  %s2390_s15 = sld [smem:[#allocation2 + $0xd81]] }
  0xb5   :  { %v837_v38 = vmul.f32 %v2019_v29, %v835_v14  ;;  %v838_v34 = vmul.f32 %v2022_v31, %v835_v14  ;;  %v839_v50 = vmul.f32 %v2025_v19, %v835_v14  ;;  %v827_v26 = vadd.f32 %v826_v9, %v822_v41  ;;  %s2396_s18 = sld [smem:[#allocation2 + $0xd82]] }
  0xb6   :  { %v828_v30 = vadd.f32 %v826_v9, %v823_v42  ;;  %v829_v17 = vadd.f32 %v826_v9, %v824_v43  ;;  %v830_v23 = vadd.f32 %v826_v9, %v825_v27  ;;  %v841_v49 = vmul.f32 %v2030_v16, %v840_v15 }
  0xb7   :  { %v842_v56 = vmul.f32 %v2033_v45, %v840_v15  ;;  %v843_v61 = vmul.f32 %v2036_v53, %v840_v15  ;;  %v844_v62 = vmul.f32 %v2039_v3, %v840_v15  ;;  %v831_v51 = vmin.f32 %v2201_v55, %v827_v26 }
  0xb8   :  { %v832_v46 = vmin.f32 %v2203_v18, %v828_v30  ;;  %v833_v32 = vmin.f32 %v2205_v5, %v829_v17  ;;  %v858_v54 = vstv %s2199_s19  ;;  %v845_v4 = vadd.f32 %v841_v49, %v836_v44  ;;  %s2411_s19 = sld [smem:[#allocation2 + $0xd83]] }
  0xb9   :  { %v846_v12 = vadd.f32 %v842_v56, %v837_v38  ;;  %v847_v24 = vadd.f32 %v843_v61, %v838_v34  ;;  %v848_v13 = vadd.f32 %v844_v62, %v839_v50  ;;  %v850_v52 = vmul.f32 %v2052_v58, %v849_v22 }
  0xba   :  { %v851_v40 = vmul.f32 %v2055_v39, %v849_v22  ;;  %v852_v36 = vmul.f32 %v2058_v35, %v849_v22  ;;  %v853_v57 = vmul.f32 %v2061_v20, %v849_v22  ;;  %v834_v59 = vmin.f32 %v2218_v11, %v830_v23 }
  0xbb   :  { %v867_v28 = vstv %s2208_s0  ;;  %v872_v37 = vstv %s2210_s1  ;;  %v881_v47 = vstv %s2216_s20  ;;  %v854_v48 = vadd.f32 %v850_v52, %v845_v4  ;;  %s2417_s0 = sld [smem:[#allocation2 + $0xe00]] }
  0xbc   :  { %v855_v55 = vadd.f32 %v851_v40, %v846_v12  ;;  %v856_v18 = vadd.f32 %v852_v36, %v847_v24  ;;  %v857_v5 = vadd.f32 %v853_v57, %v848_v13  ;;  %v868_v9 = vmul.f32 %v2016_v63, %v867_v28  ;;  %s2419_s1 = sld [smem:[#allocation2 + $0xe01]] }
  0xbd   :  { %v869_v0 = vmul.f32 %v2019_v29, %v867_v28  ;;  %v870_v1 = vmul.f32 %v2022_v31, %v867_v28  ;;  %v871_v2 = vmul.f32 %v2025_v19, %v867_v28  ;;  %v859_v6 = vadd.f32 %v858_v54, %v854_v48  ;;  %s2425_s20 = sld [smem:[#allocation2 + $0xe02]] }
  0xbe   :  { %v860_v7 = vadd.f32 %v858_v54, %v855_v55  ;;  %v861_v8 = vadd.f32 %v858_v54, %v856_v18  ;;  %v862_v21 = vadd.f32 %v858_v54, %v857_v5  ;;  %v873_v10 = vmul.f32 %v2030_v16, %v872_v37 }
  0xbf   :  { %v874_v11 = vmul.f32 %v2033_v45, %v872_v37  ;;  %v875_v14 = vmul.f32 %v2036_v53, %v872_v37  ;;  %v876_v15 = vmul.f32 %v2039_v3, %v872_v37  ;;  %v2261_v22 = vmin.f32 %v831_v51, %v859_v6 }
  0xc0   :  { %v2263_v41 = vmin.f32 %v832_v46, %v860_v7  ;;  %v2265_v42 = vmin.f32 %v833_v32, %v861_v8  ;;  %v890_v43 = vstv %s2231_s21  ;;  %v877_v27 = vadd.f32 %v873_v10, %v868_v9  ;;  %s2439_s21 = sld [smem:[#allocation2 + $0xe03]] }
  0xc1   :  { %v878_v44 = vadd.f32 %v874_v11, %v869_v0  ;;  %v879_v38 = vadd.f32 %v875_v14, %v870_v1  ;;  %v880_v34 = vadd.f32 %v876_v15, %v871_v2  ;;  %v882_v50 = vmul.f32 %v2052_v58, %v881_v47 }
  0xc2   :  { %v883_v26 = vmul.f32 %v2055_v39, %v881_v47  ;;  %v884_v30 = vmul.f32 %v2058_v35, %v881_v47  ;;  %v885_v17 = vmul.f32 %v2061_v20, %v881_v47  ;;  %v2278_v23 = vmin.f32 %v834_v59, %v862_v21 }
  0xc3   :  { %v899_v49 = vstv %s2237_s22  ;;  %v904_v56 = vstv %s2239_s23  ;;  %v913_v61 = vstv %s2245_s24  ;;  %v886_v62 = vadd.f32 %v882_v50, %v877_v27  ;;  %s2448_s22 = sld [smem:[#allocation2 + $0xe80]] }
  0xc4   :  { %v887_v51 = vadd.f32 %v883_v26, %v878_v44  ;;  %v888_v46 = vadd.f32 %v884_v30, %v879_v38  ;;  %v889_v32 = vadd.f32 %v885_v17, %v880_v34  ;;  %v900_v54 = vmul.f32 %v2016_v63, %v899_v49  ;;  %s2450_s23 = sld [smem:[#allocation2 + $0xe81]] }
  0xc5   :  { %v901_v4 = vmul.f32 %v2019_v29, %v899_v49  ;;  %v902_v12 = vmul.f32 %v2022_v31, %v899_v49  ;;  %v903_v24 = vmul.f32 %v2025_v19, %v899_v49  ;;  %v891_v13 = vadd.f32 %v890_v43, %v886_v62  ;;  %s2456_s24 = sld [smem:[#allocation2 + $0xe82]] }
  0xc6   :  { %v892_v52 = vadd.f32 %v890_v43, %v887_v51  ;;  %v893_v40 = vadd.f32 %v890_v43, %v888_v46  ;;  %v894_v36 = vadd.f32 %v890_v43, %v889_v32  ;;  %v905_v57 = vmul.f32 %v2030_v16, %v904_v56 }
  0xc7   :  { %v906_v59 = vmul.f32 %v2033_v45, %v904_v56  ;;  %v907_v28 = vmul.f32 %v2036_v53, %v904_v56  ;;  %v908_v37 = vmul.f32 %v2039_v3, %v904_v56  ;;  %v895_v47 = vmin.f32 %v2261_v22, %v891_v13 }
  0xc8   :  { %v896_v48 = vmin.f32 %v2263_v41, %v892_v52  ;;  %v897_v55 = vmin.f32 %v2265_v42, %v893_v40  ;;  %v922_v18 = vstv %s2259_s25  ;;  %v909_v5 = vadd.f32 %v905_v57, %v900_v54  ;;  %s2479_s25 = sld [smem:[#allocation2 + $0xe83]] }
  0xc9   :  { %v910_v9 = vadd.f32 %v906_v59, %v901_v4  ;;  %v911_v0 = vadd.f32 %v907_v28, %v902_v12  ;;  %v912_v1 = vadd.f32 %v908_v37, %v903_v24  ;;  %v914_v2 = vmul.f32 %v2052_v58, %v913_v61 }
  0xca   :  { %v915_v6 = vmul.f32 %v2055_v39, %v913_v61  ;;  %v916_v7 = vmul.f32 %v2058_v35, %v913_v61  ;;  %v917_v8 = vmul.f32 %v2061_v20, %v913_v61  ;;  %v898_v21 = vmin.f32 %v2278_v23, %v894_v36 }
  0xcb   :  { %v931_v10 = vstv %s2268_s26  ;;  %v936_v11 = vstv %s2270_s27  ;;  %v945_v14 = vstv %s2276_s28  ;;  %v918_v15 = vadd.f32 %v914_v2, %v909_v5  ;;  %s1467_s26 = smov [#allocation7]  }
  0xcc   :  { %v919_v22 = vadd.f32 %v915_v6, %v910_v9  ;;  %v920_v41 = vadd.f32 %v916_v7, %v911_v0  ;;  %v921_v42 = vadd.f32 %v917_v8, %v912_v1  ;;  %v932_v43 = vmul.f32 %v2016_v63, %v931_v10  ;;  %s1223_s27 = sshll.u32 %s1467_s26, 4  ;;  %s1224_s27 = int_to_ptr.vmem [resolvable:$true] %s1223_s27 }
  0xcd   :  { %v933_v27 = vmul.f32 %v2019_v29, %v931_v10  ;;  %v934_v44 = vmul.f32 %v2022_v31, %v931_v10  ;;  %v935_v38 = vmul.f32 %v2025_v19, %v931_v10  ;;  %v923_v34 = vadd.f32 %v922_v18, %v918_v15 }
  0xce   :  { %v924_v50 = vadd.f32 %v922_v18, %v919_v22  ;;  %v925_v26 = vadd.f32 %v922_v18, %v920_v41  ;;  %v926_v30 = vadd.f32 %v922_v18, %v921_v42  ;;  %v937_v17 = vmul.f32 %v2030_v16, %v936_v11 }
  0xcf   :  { %v938_v23 = vmul.f32 %v2033_v45, %v936_v11  ;;  %v939_v49 = vmul.f32 %v2036_v53, %v936_v11  ;;  %v940_v56 = vmul.f32 %v2039_v3, %v936_v11  ;;  %v2321_v61 = vmin.f32 %v895_v47, %v923_v34 }
  0xd0   :  { %v2323_v62 = vmin.f32 %v896_v48, %v924_v50  ;;  %v2325_v51 = vmin.f32 %v897_v55, %v925_v26  ;;  %v954_v46 = vstv %s2291_s29  ;;  %v941_v32 = vadd.f32 %v937_v17, %v932_v43 }
  0xd1   :  { %v942_v54 = vadd.f32 %v938_v23, %v933_v27  ;;  %v943_v4 = vadd.f32 %v939_v49, %v934_v44  ;;  %v944_v12 = vadd.f32 %v940_v56, %v935_v38  ;;  %v946_v24 = vmul.f32 %v2052_v58, %v945_v14 }
  0xd2   :  { %v947_v13 = vmul.f32 %v2055_v39, %v945_v14  ;;  %v948_v52 = vmul.f32 %v2058_v35, %v945_v14  ;;  %v949_v40 = vmul.f32 %v2061_v20, %v945_v14  ;;  %v2338_v36 = vmin.f32 %v898_v21, %v926_v30 }
  0xd3   :  { %v963_v57 = vstv %s2297_s30  ;;  %v968_v59 = vstv %s2299_s3  ;;  %v977_v28 = vstv %s2305_s4  ;;  %v950_v37 = vadd.f32 %v946_v24, %v941_v32  ;;  %s1225_s30 = sshll.u32 %s2523_s2, 4  ;;  %s1226_s30 = int_to_ptr.hbm [resolvable:$true] %s1225_s30 }
  0xd4   :  { %v951_v47 = vadd.f32 %v947_v13, %v942_v54  ;;  %v952_v48 = vadd.f32 %v948_v52, %v943_v4  ;;  %v953_v55 = vadd.f32 %v949_v40, %v944_v12  ;;  %v964_v18 = vmul.f32 %v2016_v63, %v963_v57 }
  0xd5   :  { %v965_v5 = vmul.f32 %v2019_v29, %v963_v57  ;;  %v966_v9 = vmul.f32 %v2022_v31, %v963_v57  ;;  %v967_v0 = vmul.f32 %v2025_v19, %v963_v57  ;;  %v955_v1 = vadd.f32 %v954_v46, %v950_v37 }
  0xd6   :  { %v956_v2 = vadd.f32 %v954_v46, %v951_v47  ;;  %v957_v6 = vadd.f32 %v954_v46, %v952_v48  ;;  %v958_v7 = vadd.f32 %v954_v46, %v953_v55  ;;  %v969_v8 = vmul.f32 %v2030_v16, %v968_v59 }
  0xd7   :  { %v970_v21 = vmul.f32 %v2033_v45, %v968_v59  ;;  %v971_v10 = vmul.f32 %v2036_v53, %v968_v59  ;;  %v972_v11 = vmul.f32 %v2039_v3, %v968_v59  ;;  %v959_v14 = vmin.f32 %v2321_v61, %v955_v1 }
  0xd8   :  { %v960_v15 = vmin.f32 %v2323_v62, %v956_v2  ;;  %v961_v22 = vmin.f32 %v2325_v51, %v957_v6  ;;  %v986_v41 = vstv %s2319_s5  ;;  %v973_v42 = vadd.f32 %v969_v8, %v964_v18 }
  0xd9   :  { %v974_v43 = vadd.f32 %v970_v21, %v965_v5  ;;  %v975_v27 = vadd.f32 %v971_v10, %v966_v9  ;;  %v976_v44 = vadd.f32 %v972_v11, %v967_v0  ;;  %v978_v38 = vmul.f32 %v2052_v58, %v977_v28 }
  0xda   :  { %v979_v34 = vmul.f32 %v2055_v39, %v977_v28  ;;  %v980_v50 = vmul.f32 %v2058_v35, %v977_v28  ;;  %v981_v26 = vmul.f32 %v2061_v20, %v977_v28  ;;  %v962_v30 = vmin.f32 %v2338_v36, %v958_v7 }
  0xdb   :  { %v995_v17 = vstv %s2328_s6  ;;  %v1000_v23 = vstv %s2330_s7  ;;  %v1009_v49 = vstv %s2336_s8  ;;  %v982_v56 = vadd.f32 %v978_v38, %v973_v42 }
  0xdc   :  { %v983_v61 = vadd.f32 %v979_v34, %v974_v43  ;;  %v984_v62 = vadd.f32 %v980_v50, %v975_v27  ;;  %v985_v51 = vadd.f32 %v981_v26, %v976_v44  ;;  %v996_v46 = vmul.f32 %v2016_v63, %v995_v17 }
  0xdd   :  { %v997_v32 = vmul.f32 %v2019_v29, %v995_v17  ;;  %v998_v54 = vmul.f32 %v2022_v31, %v995_v17  ;;  %v999_v4 = vmul.f32 %v2025_v19, %v995_v17  ;;  %v987_v12 = vadd.f32 %v986_v41, %v982_v56 }
  0xde   :  { %v988_v24 = vadd.f32 %v986_v41, %v983_v61  ;;  %v989_v13 = vadd.f32 %v986_v41, %v984_v62  ;;  %v990_v52 = vadd.f32 %v986_v41, %v985_v51  ;;  %v1001_v40 = vmul.f32 %v2030_v16, %v1000_v23 }
  0xdf   :  { %v1002_v36 = vmul.f32 %v2033_v45, %v1000_v23  ;;  %v1003_v57 = vmul.f32 %v2036_v53, %v1000_v23  ;;  %v1004_v59 = vmul.f32 %v2039_v3, %v1000_v23  ;;  %v2381_v28 = vmin.f32 %v959_v14, %v987_v12 }
  0xe0   :  { %v2383_v37 = vmin.f32 %v960_v15, %v988_v24  ;;  %v2385_v47 = vmin.f32 %v961_v22, %v989_v13  ;;  %v1018_v48 = vstv %s2351_s9  ;;  %v1005_v55 = vadd.f32 %v1001_v40, %v996_v46 }
  0xe1   :  { %v1006_v18 = vadd.f32 %v1002_v36, %v997_v32  ;;  %v1007_v5 = vadd.f32 %v1003_v57, %v998_v54  ;;  %v1008_v9 = vadd.f32 %v1004_v59, %v999_v4  ;;  %v1010_v0 = vmul.f32 %v2052_v58, %v1009_v49 }
  0xe2   :  { %v1011_v1 = vmul.f32 %v2055_v39, %v1009_v49  ;;  %v1012_v2 = vmul.f32 %v2058_v35, %v1009_v49  ;;  %v1013_v6 = vmul.f32 %v2061_v20, %v1009_v49  ;;  %v2398_v7 = vmin.f32 %v962_v30, %v990_v52 }
  0xe3   :  { %v1027_v8 = vstv %s2357_s10  ;;  %v1032_v21 = vstv %s2359_s11  ;;  %v1041_v10 = vstv %s2365_s12  ;;  %v1014_v11 = vadd.f32 %v1010_v0, %v1005_v55 }
  0xe4   :  { %v1015_v14 = vadd.f32 %v1011_v1, %v1006_v18  ;;  %v1016_v15 = vadd.f32 %v1012_v2, %v1007_v5  ;;  %v1017_v22 = vadd.f32 %v1013_v6, %v1008_v9  ;;  %v1028_v41 = vmul.f32 %v2016_v63, %v1027_v8 }
  0xe5   :  { %v1029_v42 = vmul.f32 %v2019_v29, %v1027_v8  ;;  %v1030_v43 = vmul.f32 %v2022_v31, %v1027_v8  ;;  %v1031_v27 = vmul.f32 %v2025_v19, %v1027_v8  ;;  %v1019_v44 = vadd.f32 %v1018_v48, %v1014_v11 }
  0xe6   :  { %v1020_v38 = vadd.f32 %v1018_v48, %v1015_v14  ;;  %v1021_v34 = vadd.f32 %v1018_v48, %v1016_v15  ;;  %v1022_v50 = vadd.f32 %v1018_v48, %v1017_v22  ;;  %v1033_v26 = vmul.f32 %v2030_v16, %v1032_v21 }
  0xe7   :  { %v1034_v30 = vmul.f32 %v2033_v45, %v1032_v21  ;;  %v1035_v17 = vmul.f32 %v2036_v53, %v1032_v21  ;;  %v1036_v23 = vmul.f32 %v2039_v3, %v1032_v21  ;;  %v1023_v49 = vmin.f32 %v2381_v28, %v1019_v44 }
  0xe8   :  { %v1024_v56 = vmin.f32 %v2383_v37, %v1020_v38  ;;  %v1025_v61 = vmin.f32 %v2385_v47, %v1021_v34  ;;  %v1050_v62 = vstv %s2379_s13  ;;  %v1037_v51 = vadd.f32 %v1033_v26, %v1028_v41 }
  0xe9   :  { %v1038_v46 = vadd.f32 %v1034_v30, %v1029_v42  ;;  %v1039_v32 = vadd.f32 %v1035_v17, %v1030_v43  ;;  %v1040_v54 = vadd.f32 %v1036_v23, %v1031_v27  ;;  %v1042_v4 = vmul.f32 %v2052_v58, %v1041_v10 }
  0xea   :  { %v1043_v12 = vmul.f32 %v2055_v39, %v1041_v10  ;;  %v1044_v24 = vmul.f32 %v2058_v35, %v1041_v10  ;;  %v1045_v13 = vmul.f32 %v2061_v20, %v1041_v10  ;;  %v1026_v52 = vmin.f32 %v2398_v7, %v1022_v50 }
  0xeb   :  { %v1059_v40 = vstv %s2388_s14  ;;  %v1064_v36 = vstv %s2390_s15  ;;  %v1073_v57 = vstv %s2396_s18  ;;  %v1046_v59 = vadd.f32 %v1042_v4, %v1037_v51 }
  0xec   :  { %v1047_v28 = vadd.f32 %v1043_v12, %v1038_v46  ;;  %v1048_v37 = vadd.f32 %v1044_v24, %v1039_v32  ;;  %v1049_v47 = vadd.f32 %v1045_v13, %v1040_v54  ;;  %v1060_v48 = vmul.f32 %v2016_v63, %v1059_v40 }
  0xed   :  { %v1061_v55 = vmul.f32 %v2019_v29, %v1059_v40  ;;  %v1062_v18 = vmul.f32 %v2022_v31, %v1059_v40  ;;  %v1063_v5 = vmul.f32 %v2025_v19, %v1059_v40  ;;  %v1051_v9 = vadd.f32 %v1050_v62, %v1046_v59 }
  0xee   :  { %v1052_v0 = vadd.f32 %v1050_v62, %v1047_v28  ;;  %v1053_v1 = vadd.f32 %v1050_v62, %v1048_v37  ;;  %v1054_v2 = vadd.f32 %v1050_v62, %v1049_v47  ;;  %v1065_v6 = vmul.f32 %v2030_v16, %v1064_v36 }
  0xef   :  { %v1066_v7 = vmul.f32 %v2033_v45, %v1064_v36  ;;  %v1067_v8 = vmul.f32 %v2036_v53, %v1064_v36  ;;  %v1068_v21 = vmul.f32 %v2039_v3, %v1064_v36  ;;  %v2441_v10 = vmin.f32 %v1023_v49, %v1051_v9 }
  0xf0   :  { %v2443_v11 = vmin.f32 %v1024_v56, %v1052_v0  ;;  %v2445_v14 = vmin.f32 %v1025_v61, %v1053_v1  ;;  %v1082_v15 = vstv %s2411_s19  ;;  %v1069_v22 = vadd.f32 %v1065_v6, %v1060_v48 }
  0xf1   :  { %v1070_v41 = vadd.f32 %v1066_v7, %v1061_v55  ;;  %v1071_v42 = vadd.f32 %v1067_v8, %v1062_v18  ;;  %v1072_v43 = vadd.f32 %v1068_v21, %v1063_v5  ;;  %v1074_v27 = vmul.f32 %v2052_v58, %v1073_v57  ;;  %v1386_v7 = vld [vmem:[#allocation6 + $0x8] sm:$0xff]  ;;  %v1387_v8 = vld [vmem:[#allocation6 + $0x10] sm:$0xff]  ;;  %v1388_v21 = vld [vmem:[#allocation6 + $0x18] sm:$0xff] }
  0xf2   :  { %v1075_v44 = vmul.f32 %v2055_v39, %v1073_v57  ;;  %v1076_v38 = vmul.f32 %v2058_v35, %v1073_v57  ;;  %v1077_v34 = vmul.f32 %v2061_v20, %v1073_v57  ;;  %v2458_v50 = vmin.f32 %v1026_v52, %v1054_v2  ;;  %v1385_v2 = vld [vmem:[#allocation6] sm:$0xff] }
  0xf3   :  { %v1091_v26 = vstv %s2417_s0  ;;  %v1096_v30 = vstv %s2419_s1  ;;  %v1105_v17 = vstv %s2425_s20  ;;  %v1078_v23 = vadd.f32 %v1074_v27, %v1069_v22 }
  0xf4   :  { %v1079_v49 = vadd.f32 %v1075_v44, %v1070_v41  ;;  %v1080_v56 = vadd.f32 %v1076_v38, %v1071_v42  ;;  %v1081_v61 = vadd.f32 %v1077_v34, %v1072_v43  ;;  %v1092_v62 = vmul.f32 %v2016_v63, %v1091_v26  ;;  %v1390_v41 = vld [vmem:[#allocation6 + $0x28] sm:$0xff]  ;;  %v1391_v43 = vld [vmem:[#allocation6 + $0x30] sm:$0xff]  ;;  %v1392_v44 = vld [vmem:[#allocation6 + $0x38] sm:$0xff] }
  0xf5   :  { %v1093_v51 = vmul.f32 %v2019_v29, %v1091_v26  ;;  %v1094_v46 = vmul.f32 %v2022_v31, %v1091_v26  ;;  %v1095_v32 = vmul.f32 %v2025_v19, %v1091_v26  ;;  %v2467_v54 = vadd.f32 %v1082_v15, %v1078_v23  ;;  %v2533_v26 = vld [vmem:[#allocation13_spill] sm:$0xff]  ;;  %v2535_v23 = vld [vmem:[#allocation14_spill] sm:$0xff] }
  0xf6   :  { %v2469_v4 = vadd.f32 %v1082_v15, %v1079_v49  ;;  %v2471_v12 = vadd.f32 %v1082_v15, %v1080_v56  ;;  %v2473_v24 = vadd.f32 %v1082_v15, %v1081_v61  ;;  %v1097_v13 = vmul.f32 %v2030_v16, %v1096_v30  ;;  %v1389_v15 = vld [vmem:[#allocation6 + $0x20] sm:$0xff] }
  0xf7   :  { %v1098_v52 = vmul.f32 %v2033_v45, %v1096_v30  ;;  %v1099_v63 = vmul.f32 %v2036_v53, %v1096_v30  ;;  %v1100_v29 = vmul.f32 %v2039_v3, %v1096_v30  ;;  %v1087_v31 = vmin.f32 %v2441_v10, %v2467_v54 }
  0xf8   :  { %v1088_v19 = vmin.f32 %v2443_v11, %v2469_v4  ;;  %v1089_v16 = vmin.f32 %v2445_v14, %v2471_v12  ;;  %v1114_v40 = vstv %s2439_s21  ;;  %v1101_v45 = vadd.f32 %v1097_v13, %v1092_v62  ;;  %v1394_v4 = vld [vmem:[#allocation6 + $0x48] sm:$0xff] }
  0xf9   :  { %v1102_v36 = vadd.f32 %v1098_v52, %v1093_v51  ;;  %v1103_v53 = vadd.f32 %v1099_v63, %v1094_v46  ;;  %v1104_v57 = vadd.f32 %v1100_v29, %v1095_v32  ;;  %v1106_v3 = vmul.f32 %v2052_v58, %v1105_v17  ;;  %v1393_v32 = vld [vmem:[#allocation6 + $0x40] sm:$0xff]  ;;  %v1396_v52 = vld [vmem:[#allocation6 + $0x58] sm:$0xff] }
  0xfa   :  { %v1107_v59 = vmul.f32 %v2055_v39, %v1105_v17  ;;  %v1108_v28 = vmul.f32 %v2058_v35, %v1105_v17  ;;  %v1109_v37 = vmul.f32 %v2061_v20, %v1105_v17  ;;  %v1090_v47 = vmin.f32 %v2458_v50, %v2473_v24  ;;  %v2532_v50 = vld [vmem:[#allocation11_spill] sm:$0xff]  ;;  %v2534_v17 = vld [vmem:[#allocation12_spill] sm:$0xff]  ;;  %v1395_v24 = vld [vmem:[#allocation6 + $0x50] sm:$0xff] }
  0xfb   :  { %v1123_v48 = vstv %s2448_s22  ;;  %v1128_v55 = vstv %s2450_s23  ;;  %v1137_v18 = vstv %s2456_s24  ;;  %v1110_v5 = vadd.f32 %v1106_v3, %v1101_v45  ;;  %v2536_v3 = vld [vmem:[#allocation15_spill] sm:$0xff] }
  0xfc   :  { %v1111_v9 = vadd.f32 %v1107_v59, %v1102_v36  ;;  %v1112_v0 = vadd.f32 %v1108_v28, %v1103_v53  ;;  %v1113_v1 = vadd.f32 %v1109_v37, %v1104_v57  ;;  %v1124_v6 = vmul.f32 %v1385_v2, %v1123_v48  ;;  %v2537_v28 = vld [vmem:[#allocation16_spill] sm:$0xff] }
  0xfd   :  { %v1125_v58 = vmul.f32 %v1386_v7, %v1123_v48  ;;  %v1126_v39 = vmul.f32 %v1387_v8, %v1123_v48  ;;  %v1127_v35 = vmul.f32 %v1388_v21, %v1123_v48  ;;  %v1115_v20 = vadd.f32 %v1114_v40, %v1110_v5  ;;  %v2538_v48 = vld [vmem:[#allocation17_spill] sm:$0xff]  ;;  %v2539_v5 = vld [vmem:[#allocation18_spill] sm:$0xff] }
  0xfe   :  { %v1116_v10 = vadd.f32 %v1114_v40, %v1111_v9  ;;  %v1117_v11 = vadd.f32 %v1114_v40, %v1112_v0  ;;  %v1118_v14 = vadd.f32 %v1114_v40, %v1113_v1  ;;  %v1129_v22 = vmul.f32 %v1389_v15, %v1128_v55 }
  0xff   :  { %v1130_v42 = vmul.f32 %v1390_v41, %v1128_v55  ;;  %v1131_v27 = vmul.f32 %v1391_v43, %v1128_v55  ;;  %v1132_v38 = vmul.f32 %v1392_v44, %v1128_v55  ;;  %v188_v34 = vadd.f32 %v1677_v33, %v1661_v25 }
 0x100   :  { %v189_v30 = vadd.f32 %v2533_v26, %v2532_v50  ;;  %v190_v49 = vadd.f32 %v2535_v23, %v2534_v17  ;;  %v1146_v56 = vstv %s2479_s25  ;;  %v1133_v61 = vadd.f32 %v1129_v22, %v1124_v6 }
 0x101   :  { %v1134_v62 = vadd.f32 %v1130_v42, %v1125_v58  ;;  %v1135_v51 = vadd.f32 %v1131_v27, %v1126_v39  ;;  %v1136_v46 = vadd.f32 %v1132_v38, %v1127_v35  ;;  %v1138_v54 = vmul.f32 %v1393_v32, %v1137_v18 }
 0x102   :  { %v1139_v12 = vmul.f32 %v1394_v4, %v1137_v18  ;;  %v1140_v13 = vmul.f32 %v1395_v24, %v1137_v18  ;;  %v1141_v63 = vmul.f32 %v1396_v52, %v1137_v18  ;;  %v1119_v25 = vmin.f32 %v1087_v31, %v1115_v20 }
 0x103   :  { %v1120_v33 = vmin.f32 %v1088_v19, %v1116_v10  ;;  %v1121_v29 = vmin.f32 %v1089_v16, %v1117_v11  ;;  %v1122_v40 = vmin.f32 %v1090_v47, %v1118_v14  ;;  %v1142_v45 = vadd.f32 %v1138_v54, %v1133_v61 }
 0x104   :  { %v1143_v36 = vadd.f32 %v1139_v12, %v1134_v62  ;;  %v1144_v53 = vadd.f32 %v1140_v13, %v1135_v51  ;;  %v1145_v57 = vadd.f32 %v1141_v63, %v1136_v46  ;;  %v195_v59 = vadd.f32 %v2536_v3, %v1779_v60 }
 0x105   :  { %v196_v37 = vadd.f32 %v2537_v28, %v188_v34  ;;  %v197_v55 = vadd.f32 %v2538_v48, %v189_v30  ;;  %v198_v9 = vadd.f32 %v2539_v5, %v190_v49  ;;  %v1147_v0 = vadd.f32 %v1146_v56, %v1142_v45 }
 0x106   :  { %v1148_v1 = vadd.f32 %v1146_v56, %v1143_v36  ;;  %v1149_v18 = vadd.f32 %v1146_v56, %v1144_v53  ;;  %v1150_v31 = vadd.f32 %v1146_v56, %v1145_v57 }
 0x107   :  { %v1151_v19 = vmin.f32 %v1119_v25, %v1147_v0 }
 0x108   :  { %v1152_v16 = vmin.f32 %v1120_v33, %v1148_v1  ;;  %v1153_v47 = vmin.f32 %v1121_v29, %v1149_v18  ;;  %v1154_v2 = vmin.f32 %v1122_v40, %v1150_v31 }
 0x109   :  { %v1155_v6 = vadd.f32 %v1151_v19, %v195_v59 }
 0x10a   :  { %v1156_v7 = vadd.f32 %v1152_v16, %v196_v37  ;;  %v1157_v58 = vadd.f32 %v1153_v47, %v197_v55  ;;  %v1158_v8 = vadd.f32 %v1154_v2, %v198_v9 }
 0x10b   :  { %v1159_v39 = vmax.f32 %v1155_v6, 0.0 }
 0x10c   :  { %v1160_v60 = vmax.f32 %v1156_v7, 0.0  ;;  %v1161_v21 = vmax.f32 %v1157_v58, 0.0  ;;  %v1162_v35 = vmax.f32 %v1158_v8, 0.0 }
 0x10d   :  { %1365 = vrsqrt.f32 %v1159_v39  ;;  %vm1170_vm0 = vcmp.eq.f32.partialorder %v1159_v39, inf  ;;  %vm1172_vm1 = vcmp.eq.f32.partialorder %v1159_v39, 0.0  ;;  %v1173_v56 = vand.u32 2147483648, %v1159_v39 }
 0x10e   :  { %1367 = vrsqrt.f32 %v1160_v60  ;;  %vm1182_vm2 = vcmp.eq.f32.partialorder %v1160_v60, inf  ;;  %vm1184_vm3 = vcmp.eq.f32.partialorder %v1160_v60, 0.0  ;;  %v1185_v32 = vand.u32 2147483648, %v1160_v60 }
 0x10f   :  { %1369 = vrsqrt.f32 %v1161_v21  ;;  %vm1194_vm4 = vcmp.eq.f32.partialorder %v1161_v21, inf  ;;  %vm1196_vm5 = vcmp.eq.f32.partialorder %v1161_v21, 0.0  ;;  %v1197_v12 = vand.u32 2147483648, %v1161_v21 }
 0x110   :  { %1371 = vrsqrt.f32 %v1162_v35  ;;  %vm1206_vm6 = vcmp.eq.f32.partialorder %v1162_v35, inf  ;;  %v1209_v63 = vand.u32 2147483648, %v1162_v35  ;;  %vm1208_vm7 = vcmp.eq.f32.partialorder %v1162_v35, 0.0 }
 0x113   :  { %v1366_v20 = vpop.eup %1365 }
 0x114   :  { %v1368_v10 = vpop.eup %1367  ;;  %v1164_v11 = vmul.f32 %v1366_v20, %v1159_v39 }
 0x115   :  { %v1370_v14 = vpop.eup %1369  ;;  %v1176_v15 = vmul.f32 %v1368_v10, %v1160_v60 }
 0x116   :  { %v1372_v22 = vpop.eup %1371  ;;  %v1165_v41 = vmul.f32 %v1366_v20, %v1164_v11  ;;  %v1188_v42 = vmul.f32 %v1370_v14, %v1161_v21 }
 0x117   :  { %v1177_v43 = vmul.f32 %v1368_v10, %v1176_v15  ;;  %v1200_v27 = vmul.f32 %v1372_v22, %v1162_v35 }
 0x118   :  { %v1166_v44 = vmul.f32 0.5, %v1165_v41  ;;  %v1189_v38 = vmul.f32 %v1370_v14, %v1188_v42 }
 0x119   :  { %v1178_v34 = vmul.f32 0.5, %v1177_v43  ;;  %v1201_v50 = vmul.f32 %v1372_v22, %v1200_v27 }
 0x11a   :  { %v1167_v26 = vsub.f32 1.5, %v1166_v44  ;;  %v1190_v30 = vmul.f32 0.5, %v1189_v38 }
 0x11b   :  { %v1179_v17 = vsub.f32 1.5, %v1178_v34  ;;  %v1202_v23 = vmul.f32 0.5, %v1201_v50 }
 0x11c   :  { %v1168_v49 = vmul.f32 %v1366_v20, %v1167_v26  ;;  %v1191_v61 = vsub.f32 1.5, %v1190_v30 }
 0x11d   :  { %v1180_v62 = vmul.f32 %v1368_v10, %v1179_v17  ;;  %v1203_v51 = vsub.f32 1.5, %v1202_v23 }
 0x11e   :  { %v1169_v46 = vmul.f32 %v1168_v49, %v1159_v39  ;;  %v1192_v54 = vmul.f32 %v1370_v14, %v1191_v61 }
 0x11f   :  { %v1181_v4 = vmul.f32 %v1180_v62, %v1160_v60  ;;  %v1204_v24 = vmul.f32 %v1372_v22, %v1203_v51 }
 0x120   :  { %v1171_v13 = vsel %vm1170_vm0, %v1159_v39, %v1169_v46  ;;  %v1193_v52 = vmul.f32 %v1192_v54, %v1161_v21 }
 0x121   :  { %v1174_v25 = vsel %vm1172_vm1, %v1173_v56, %v1171_v13  ;;  %v1183_v33 = vsel %vm1182_vm2, %v1160_v60, %v1181_v4  ;;  %v1205_v29 = vmul.f32 %v1204_v24, %v1162_v35 }
 0x122   :  { %v1186_v40 = vsel %vm1184_vm3, %v1185_v32, %v1183_v33  ;;  %v1195_v45 = vsel %vm1194_vm4, %v1161_v21, %v1193_v52  ;;  %1215 = vst [vmem:[#allocation7] sm:$0xff] %v1174_v25 }
 0x123   :  { %v1198_v36 = vsel %vm1196_vm5, %v1197_v12, %v1195_v45  ;;  %v1207_v53 = vsel %vm1206_vm6, %v1162_v35, %v1205_v29  ;;  %1216 = vst [vmem:[#allocation7 + $0x8] sm:$0xff] %v1186_v40 }
 0x124   :  { %v1210_v57 = vsel %vm1208_vm7, %v1209_v63, %v1207_v53  ;;  %1217 = vst [vmem:[#allocation7 + $0x10] sm:$0xff] %v1198_v36 }
 0x125   :  { %1218 = vst [vmem:[#allocation7 + $0x18] sm:$0xff] %v1210_v57 }
 0x126   :  { %1231 = dma.vmem_to_hbm [thread:$0]  %s1224_s27, 512, %s1226_s30, [#allocation4], %s1464_s16, %s1464_s16, %s1465_s17  }
 0x127   :  { %1461 = dma.done.wait [#allocation4], 512  }
 0x128   :  { %1462 = vsyncadd [#allocation4], 4294966784 }
 0x129   :  { %1236 = vsyncpa [#allocation3], 1 }
 0x12a   :  { %1237 = vsyncpa [#allocation4], 1 }
 0x12b   :  { %1238 = vsyncpa [#allocation5], 1 }

</bundles_post_ra>
